<compile_context>
chip_gen: v7x
topology: tpu7x:2x2x1
jax: 0.10.0
libtpu: 0.0.40
codegen_flags: <defaults>
</compile_context>

<pallas_src>
import jax
import jax.numpy as jnp
from jax import lax
from jax.experimental import pallas as pl
from jax.experimental.pallas import tpu as pltpu


def _deconv2x2_kernel(w_ref, x_ref, o_ref):
    """One (n, h-tile) block of ConvTranspose2d(k=2, s=2, p=0, bias=False).

    w_ref : SMEM (C_in*C_out*4,) f32 -- PyTorch weight (C_in, C_out, 2, 2), row-major flat.
    x_ref : VMEM (1, C_in, th, W)    -- input block, native NCHW.
    o_ref : VMEM (1, C_out, th, 4W)  -- output block; last axis ordered (kh, w, kw) so a
            contiguous reshape (H, 4W) -> (2H, 2W) outside the kernel yields NCHW output.
    """
    C_in = x_ref.shape[1]
    th = x_ref.shape[2]
    W = x_ref.shape[3]
    C_out = o_ref.shape[1]
    W2 = 2 * W

    # Constant one-hot scatter matrices F[i][j]: (W, 4W), F[i][j][w, i*2W + 2w + j] = 1.
    # y(th, W) @ F[i][j] places column w of y at output column i*2W + 2w + j.
    row = lax.broadcasted_iota(jnp.int32, (W, 4 * W), 0)
    col = lax.broadcasted_iota(jnp.int32, (W, 4 * W), 1)
    F = [[(col == (i * W2 + 2 * row + j)).astype(jnp.float32) for j in range(2)]
         for i in range(2)]

    for co in range(C_out):
        # y[i][j][t, w] = sum_ci x[ci, t, w] * weight[ci, co, i, j]   (VPU, SMEM scalar bcast)
        y = [[jnp.zeros((th, W), jnp.float32) for _ in range(2)] for _ in range(2)]
        for ci in range(C_in):
            xc = x_ref[0, ci]  # (th, W)
            for i in range(2):
                for j in range(2):
                    wv = w_ref[((ci * C_out + co) * 2 + i) * 2 + j]
                    y[i][j] = y[i][j] + xc * wv
        # Scatter the four (th, W) slabs into the lane-interleaved (th, 4W) row block.
        acc = jnp.zeros((th, 4 * W), jnp.float32)
        for i in range(2):
            for j in range(2):
                acc = acc + jnp.dot(y[i][j], F[i][j], preferred_element_type=jnp.float32)
        o_ref[0, co, :, :] = acc.astype(o_ref.dtype)


def _choose_h_tile(N, H, W, bytes_per_h_row):
    """Largest multiple-of-8 divisor of H within the vreg/VMEM block budget."""
    divisors = [d for d in range(8, H + 1, 8) if H % d == 0]
    if not divisors:
        # TODO(synk): H not a multiple of 8 -- fall back to a single full-H tile.
        return H
    acc_limit = 32 * 1024          # per-channel f32 accumulator (th, 4W) kept in vregs
    blk_limit = 2 * 1024 * 1024    # per-step DMA block budget
    th = divisors[0]
    for d in divisors:
        if d * 4 * W * 4 <= acc_limit and d * bytes_per_h_row <= blk_limit:
            th = d
    # Prefer >= 2 grid steps so both v7x TensorCores get work.
    while N * (H // th) < 2 and (th // 2) in divisors:
        th //= 2
    return th


def upsample_forward(x1, x2, weight):
    """ConvTranspose2d(k=2, s=2, p=0, bias=False) forward, output sized like x2.

    x1:     (N, C_in, H, W)      NCHW
    x2:     (N, C_out, 2H, 2W)   only its shape is used (output_size)
    weight: (C_in, C_out, 2, 2)  PyTorch ConvTranspose2d weight layout
    """
    N, C_in, H, W = x1.shape
    C_out = weight.shape[1]
    assert weight.shape == (C_in, C_out, 2, 2), weight.shape
    assert x2.shape == (N, C_out, 2 * H, 2 * W), (
        "output_size (x2.shape) must be (N, C_out, 2H, 2W) for k=2, s=2, p=0")
    # TODO(synk): output_padding (odd output_size) cannot occur for k=2,s=2,p=0 with
    # x2 spatial == 2 * x1 spatial, so it is not handled.

    # Weight scalars live in SMEM, flattened row-major (ci, co, kh, kw) -- no transpose.
    w_flat = weight.reshape(-1).astype(jnp.float32)

    bytes_per_h_row = 4 * (C_in * W + C_out * 4 * W)   # f32 input + output per h-row
    th = _choose_h_tile(N, H, W, bytes_per_h_row)
    grid = (N, H // th)

    block_bytes = th * bytes_per_h_row
    vmem_limit = int(min(48 * 2**20, max(4 * 2**20, 8 * block_bytes)))

    out4 = pl.pallas_call(
        _deconv2x2_kernel,
        out_shape=jax.ShapeDtypeStruct((N, C_out, H, 4 * W), x1.dtype),
        grid_spec=pltpu.PrefetchScalarGridSpec(
            num_scalar_prefetch=0,
            grid=grid,
            in_specs=[
                pl.BlockSpec(memory_space=pltpu.MemorySpace.SMEM),            # weight
                pl.BlockSpec((1, C_in, th, W), lambda n, hb: (n, 0, hb, 0)),  # x1 (NCHW)
            ],
            out_specs=pl.BlockSpec((1, C_out, th, 4 * W),
                                   lambda n, hb: (n, 0, hb, 0)),
        ),
        compiler_params=pltpu.CompilerParams(
            dimension_semantics=("parallel", "parallel"),
            vmem_limit_bytes=vmem_limit,
        ),
    )(w_flat, x1)

    # Free reshape: last axis is already ordered (kh, w, kw), i.e. element order is
    # (n, co, h, kh, w, kw) == NCHW of the 2x-upsampled output.
    return out4.reshape(N, C_out, 2 * H, 2 * W)


def _reference(x1, weight):
    # out[n, co, 2h+i, 2w+j] = sum_ci x1[n, ci, h, w] * weight[ci, co, i, j]
    N, C_in, H, W = x1.shape
    C_out = weight.shape[1]
    r = jnp.einsum("nchw,coij->nohiwj", x1, weight)
    return r.reshape(N, C_out, 2 * H, 2 * W)


if __name__ == "__main__":
    # module config: upsample(output_channels=4, in_channels=8)
    output_channels = 4   # = C_in of the deconv (channels of x1)
    in_channels = 8       # = C_out of the deconv (channels of x2 / output)
    N, H, W = 2, 16, 16

    key = jax.random.PRNGKey(0)
    kx1, kx2, kw = jax.random.split(key, 3)
    x1 = jax.random.normal(kx1, (N, output_channels, H, W), dtype=jnp.float32)
    x2 = jax.random.normal(kx2, (N, in_channels, 2 * H, 2 * W), dtype=jnp.float32)
    # Deterministic ConvTranspose2d weight, PyTorch layout (C_in, C_out, kH, kW)
    weight = (
        jax.random.normal(kw, (output_channels, in_channels, 2, 2), dtype=jnp.float32)
        * 0.1
    )

    out = upsample_forward(x1, x2, weight)
    out = jax.block_until_ready(out)

    ref = _reference(x1, weight)
    assert out.shape == x2.shape, (out.shape, x2.shape)
    assert jnp.allclose(out, ref, atol=1e-5, rtol=1e-5), "mismatch vs reference"
    print("KERNEL_OK")
</pallas_src>

<mosaic_0001>
module attributes {stable_mosaic.version = 11 : i64} {
  func.func @_deconv2x2_kernel(%arg0: i32, %arg1: i32, %arg2: memref<128xf32, #tpu.memory_space<smem>>, %arg3: memref<1x4x16x16xf32, #tpu.memory_space<vmem>>, %arg4: memref<1x8x16x64xf32, #tpu.memory_space<vmem>>) attributes {dimension_semantics = [#tpu.dimension_semantics<parallel>, #tpu.dimension_semantics<parallel>], iteration_bounds = array<i64: 2, 1>, scalar_prefetch = 0 : i64, scratch_operands = 0 : i64, tpu.core_type = #tpu.core_type<tc>, window_params = [{transform_indices = @transform_0, window_bounds = array<i64: 128>}, {transform_indices = @transform_1, window_bounds = array<i64: 1, 4, 16, 16>}, {transform_indices = @transform_2, window_bounds = array<i64: 1, 8, 16, 64>}]} {
    %0 = tpu.iota {dimensions = array<i32: 0>} : vector<16x64xi32>
    %1 = tpu.iota {dimensions = array<i32: 1>} : vector<16x64xi32>
    %c2_i32 = arith.constant 2 : i32
    %2 = vector.broadcast %c2_i32 : i32 to vector<16x64xi32>
    %3 = arith.muli %2, %0 : vector<16x64xi32>
    %c0_i32 = arith.constant 0 : i32
    %4 = vector.broadcast %c0_i32 : i32 to vector<16x64xi32>
    %5 = arith.addi %4, %3 : vector<16x64xi32>
    %c0_i32_0 = arith.constant 0 : i32
    %6 = vector.broadcast %c0_i32_0 : i32 to vector<16x64xi32>
    %7 = arith.addi %5, %6 : vector<16x64xi32>
    %8 = arith.cmpi eq, %1, %7 : vector<16x64xi32>
    %9 = arith.extui %8 : vector<16x64xi1> to vector<16x64xi32>
    %10 = arith.sitofp %9 : vector<16x64xi32> to vector<16x64xf32>
    %c2_i32_1 = arith.constant 2 : i32
    %11 = vector.broadcast %c2_i32_1 : i32 to vector<16x64xi32>
    %12 = arith.muli %11, %0 : vector<16x64xi32>
    %c0_i32_2 = arith.constant 0 : i32
    %13 = vector.broadcast %c0_i32_2 : i32 to vector<16x64xi32>
    %14 = arith.addi %13, %12 : vector<16x64xi32>
    %c1_i32 = arith.constant 1 : i32
    %15 = vector.broadcast %c1_i32 : i32 to vector<16x64xi32>
    %16 = arith.addi %14, %15 : vector<16x64xi32>
    %17 = arith.cmpi eq, %1, %16 : vector<16x64xi32>
    %18 = arith.extui %17 : vector<16x64xi1> to vector<16x64xi32>
    %19 = arith.sitofp %18 : vector<16x64xi32> to vector<16x64xf32>
    %c2_i32_3 = arith.constant 2 : i32
    %20 = vector.broadcast %c2_i32_3 : i32 to vector<16x64xi32>
    %21 = arith.muli %20, %0 : vector<16x64xi32>
    %c32_i32 = arith.constant 32 : i32
    %22 = vector.broadcast %c32_i32 : i32 to vector<16x64xi32>
    %23 = arith.addi %22, %21 : vector<16x64xi32>
    %c0_i32_4 = arith.constant 0 : i32
    %24 = vector.broadcast %c0_i32_4 : i32 to vector<16x64xi32>
    %25 = arith.addi %23, %24 : vector<16x64xi32>
    %26 = arith.cmpi eq, %1, %25 : vector<16x64xi32>
    %27 = arith.extui %26 : vector<16x64xi1> to vector<16x64xi32>
    %28 = arith.sitofp %27 : vector<16x64xi32> to vector<16x64xf32>
    %c2_i32_5 = arith.constant 2 : i32
    %29 = vector.broadcast %c2_i32_5 : i32 to vector<16x64xi32>
    %30 = arith.muli %29, %0 : vector<16x64xi32>
    %c32_i32_6 = arith.constant 32 : i32
    %31 = vector.broadcast %c32_i32_6 : i32 to vector<16x64xi32>
    %32 = arith.addi %31, %30 : vector<16x64xi32>
    %c1_i32_7 = arith.constant 1 : i32
    %33 = vector.broadcast %c1_i32_7 : i32 to vector<16x64xi32>
    %34 = arith.addi %32, %33 : vector<16x64xi32>
    %35 = arith.cmpi eq, %1, %34 : vector<16x64xi32>
    %36 = arith.extui %35 : vector<16x64xi1> to vector<16x64xi32>
    %37 = arith.sitofp %36 : vector<16x64xi32> to vector<16x64xf32>
    %cst = arith.constant 0.000000e+00 : f32
    %38 = vector.broadcast %cst : f32 to vector<16x16xf32>
    %cst_8 = arith.constant 0.000000e+00 : f32
    %39 = vector.broadcast %cst_8 : f32 to vector<16x16xf32>
    %cst_9 = arith.constant 0.000000e+00 : f32
    %40 = vector.broadcast %cst_9 : f32 to vector<16x16xf32>
    %cst_10 = arith.constant 0.000000e+00 : f32
    %41 = vector.broadcast %cst_10 : f32 to vector<16x16xf32>
    %c0 = arith.constant 0 : index
    %c0_11 = arith.constant 0 : index
    %c0_12 = arith.constant 0 : index
    %c0_13 = arith.constant 0 : index
    %42 = vector.load %arg3[%c0, %c0_11, %c0_12, %c0_13] : memref<1x4x16x16xf32, #tpu.memory_space<vmem>>, vector<1x1x16x16xf32>
    %43 = vector.shape_cast %42 : vector<1x1x16x16xf32> to vector<16x16xf32>
    %c0_14 = arith.constant 0 : index
    %44 = memref.load %arg2[%c0_14] : memref<128xf32, #tpu.memory_space<smem>>
    %45 = vector.broadcast %44 : f32 to vector<16x16xf32>
    %46 = arith.mulf %43, %45 : vector<16x16xf32>
    %47 = arith.addf %38, %46 : vector<16x16xf32>
    %c1 = arith.constant 1 : index
    %48 = memref.load %arg2[%c1] : memref<128xf32, #tpu.memory_space<smem>>
    %49 = vector.broadcast %48 : f32 to vector<16x16xf32>
    %50 = arith.mulf %43, %49 : vector<16x16xf32>
    %51 = arith.addf %39, %50 : vector<16x16xf32>
    %c2 = arith.constant 2 : index
    %52 = memref.load %arg2[%c2] : memref<128xf32, #tpu.memory_space<smem>>
    %53 = vector.broadcast %52 : f32 to vector<16x16xf32>
    %54 = arith.mulf %43, %53 : vector<16x16xf32>
    %55 = arith.addf %40, %54 : vector<16x16xf32>
    %c3 = arith.constant 3 : index
    %56 = memref.load %arg2[%c3] : memref<128xf32, #tpu.memory_space<smem>>
    %57 = vector.broadcast %56 : f32 to vector<16x16xf32>
    %58 = arith.mulf %43, %57 : vector<16x16xf32>
    %59 = arith.addf %41, %58 : vector<16x16xf32>
    %c0_15 = arith.constant 0 : index
    %c1_16 = arith.constant 1 : index
    %c0_17 = arith.constant 0 : index
    %c0_18 = arith.constant 0 : index
    %60 = vector.load %arg3[%c0_15, %c1_16, %c0_17, %c0_18] : memref<1x4x16x16xf32, #tpu.memory_space<vmem>>, vector<1x1x16x16xf32>
    %61 = vector.shape_cast %60 : vector<1x1x16x16xf32> to vector<16x16xf32>
    %c32 = arith.constant 32 : index
    %62 = memref.load %arg2[%c32] : memref<128xf32, #tpu.memory_space<smem>>
    %63 = vector.broadcast %62 : f32 to vector<16x16xf32>
    %64 = arith.mulf %61, %63 : vector<16x16xf32>
    %65 = arith.addf %47, %64 : vector<16x16xf32>
    %c33 = arith.constant 33 : index
    %66 = memref.load %arg2[%c33] : memref<128xf32, #tpu.memory_space<smem>>
    %67 = vector.broadcast %66 : f32 to vector<16x16xf32>
    %68 = arith.mulf %61, %67 : vector<16x16xf32>
    %69 = arith.addf %51, %68 : vector<16x16xf32>
    %c34 = arith.constant 34 : index
    %70 = memref.load %arg2[%c34] : memref<128xf32, #tpu.memory_space<smem>>
    %71 = vector.broadcast %70 : f32 to vector<16x16xf32>
    %72 = arith.mulf %61, %71 : vector<16x16xf32>
    %73 = arith.addf %55, %72 : vector<16x16xf32>
    %c35 = arith.constant 35 : index
    %74 = memref.load %arg2[%c35] : memref<128xf32, #tpu.memory_space<smem>>
    %75 = vector.broadcast %74 : f32 to vector<16x16xf32>
    %76 = arith.mulf %61, %75 : vector<16x16xf32>
    %77 = arith.addf %59, %76 : vector<16x16xf32>
    %c0_19 = arith.constant 0 : index
    %c2_20 = arith.constant 2 : index
    %c0_21 = arith.constant 0 : index
    %c0_22 = arith.constant 0 : index
    %78 = vector.load %arg3[%c0_19, %c2_20, %c0_21, %c0_22] : memref<1x4x16x16xf32, #tpu.memory_space<vmem>>, vector<1x1x16x16xf32>
    %79 = vector.shape_cast %78 : vector<1x1x16x16xf32> to vector<16x16xf32>
    %c64 = arith.constant 64 : index
    %80 = memref.load %arg2[%c64] : memref<128xf32, #tpu.memory_space<smem>>
    %81 = vector.broadcast %80 : f32 to vector<16x16xf32>
    %82 = arith.mulf %79, %81 : vector<16x16xf32>
    %83 = arith.addf %65, %82 : vector<16x16xf32>
    %c65 = arith.constant 65 : index
    %84 = memref.load %arg2[%c65] : memref<128xf32, #tpu.memory_space<smem>>
    %85 = vector.broadcast %84 : f32 to vector<16x16xf32>
    %86 = arith.mulf %79, %85 : vector<16x16xf32>
    %87 = arith.addf %69, %86 : vector<16x16xf32>
    %c66 = arith.constant 66 : index
    %88 = memref.load %arg2[%c66] : memref<128xf32, #tpu.memory_space<smem>>
    %89 = vector.broadcast %88 : f32 to vector<16x16xf32>
    %90 = arith.mulf %79, %89 : vector<16x16xf32>
    %91 = arith.addf %73, %90 : vector<16x16xf32>
    %c67 = arith.constant 67 : index
    %92 = memref.load %arg2[%c67] : memref<128xf32, #tpu.memory_space<smem>>
    %93 = vector.broadcast %92 : f32 to vector<16x16xf32>
    %94 = arith.mulf %79, %93 : vector<16x16xf32>
    %95 = arith.addf %77, %94 : vector<16x16xf32>
    %c0_23 = arith.constant 0 : index
    %c3_24 = arith.constant 3 : index
    %c0_25 = arith.constant 0 : index
    %c0_26 = arith.constant 0 : index
    %96 = vector.load %arg3[%c0_23, %c3_24, %c0_25, %c0_26] : memref<1x4x16x16xf32, #tpu.memory_space<vmem>>, vector<1x1x16x16xf32>
    %97 = vector.shape_cast %96 : vector<1x1x16x16xf32> to vector<16x16xf32>
    %c96 = arith.constant 96 : index
    %98 = memref.load %arg2[%c96] : memref<128xf32, #tpu.memory_space<smem>>
    %99 = vector.broadcast %98 : f32 to vector<16x16xf32>
    %100 = arith.mulf %97, %99 : vector<16x16xf32>
    %101 = arith.addf %83, %100 : vector<16x16xf32>
    %c97 = arith.constant 97 : index
    %102 = memref.load %arg2[%c97] : memref<128xf32, #tpu.memory_space<smem>>
    %103 = vector.broadcast %102 : f32 to vector<16x16xf32>
    %104 = arith.mulf %97, %103 : vector<16x16xf32>
    %105 = arith.addf %87, %104 : vector<16x16xf32>
    %c98 = arith.constant 98 : index
    %106 = memref.load %arg2[%c98] : memref<128xf32, #tpu.memory_space<smem>>
    %107 = vector.broadcast %106 : f32 to vector<16x16xf32>
    %108 = arith.mulf %97, %107 : vector<16x16xf32>
    %109 = arith.addf %91, %108 : vector<16x16xf32>
    %c99 = arith.constant 99 : index
    %110 = memref.load %arg2[%c99] : memref<128xf32, #tpu.memory_space<smem>>
    %111 = vector.broadcast %110 : f32 to vector<16x16xf32>
    %112 = arith.mulf %97, %111 : vector<16x16xf32>
    %113 = arith.addf %95, %112 : vector<16x16xf32>
    %cst_27 = arith.constant 0.000000e+00 : f32
    %114 = vector.broadcast %cst_27 : f32 to vector<16x64xf32>
    %cst_28 = arith.constant dense<0.000000e+00> : vector<16x64xf32>
    %115 = tpu.matmul %101, %10, %cst_28 {dimension_numbers = #tpu.dot_dimension_numbers<[1], [0], [0], [1], [0, 0, 1, 1], [], []>} : vector<16x16xf32>, vector<16x64xf32>, vector<16x64xf32> -> vector<16x64xf32>
    %116 = arith.addf %114, %115 : vector<16x64xf32>
    %cst_29 = arith.constant dense<0.000000e+00> : vector<16x64xf32>
    %117 = tpu.matmul %105, %19, %cst_29 {dimension_numbers = #tpu.dot_dimension_numbers<[1], [0], [0], [1], [0, 0, 1, 1], [], []>} : vector<16x16xf32>, vector<16x64xf32>, vector<16x64xf32> -> vector<16x64xf32>
    %118 = arith.addf %116, %117 : vector<16x64xf32>
    %cst_30 = arith.constant dense<0.000000e+00> : vector<16x64xf32>
    %119 = tpu.matmul %109, %28, %cst_30 {dimension_numbers = #tpu.dot_dimension_numbers<[1], [0], [0], [1], [0, 0, 1, 1], [], []>} : vector<16x16xf32>, vector<16x64xf32>, vector<16x64xf32> -> vector<16x64xf32>
    %120 = arith.addf %118, %119 : vector<16x64xf32>
    %cst_31 = arith.constant dense<0.000000e+00> : vector<16x64xf32>
    %121 = tpu.matmul %113, %37, %cst_31 {dimension_numbers = #tpu.dot_dimension_numbers<[1], [0], [0], [1], [0, 0, 1, 1], [], []>} : vector<16x16xf32>, vector<16x64xf32>, vector<16x64xf32> -> vector<16x64xf32>
    %122 = arith.addf %120, %121 : vector<16x64xf32>
    %c0_32 = arith.constant 0 : index
    %c0_33 = arith.constant 0 : index
    %c0_34 = arith.constant 0 : index
    %c0_35 = arith.constant 0 : index
    %123 = vector.load %arg4[%c0_32, %c0_33, %c0_34, %c0_35] : memref<1x8x16x64xf32, #tpu.memory_space<vmem>>, vector<1x1x16x64xf32>
    %124 = vector.shape_cast %123 : vector<1x1x16x64xf32> to vector<16x64xf32>
    %125 = vector.shape_cast %122 : vector<16x64xf32> to vector<1x1x16x64xf32>
    tpu.vector_store %arg4[%c0_32, %c0_33, %c0_34, %c0_35], %125 {strides = array<i32>} : memref<1x8x16x64xf32, #tpu.memory_space<vmem>>, vector<1x1x16x64xf32>,
    %cst_36 = arith.constant 0.000000e+00 : f32
    %126 = vector.broadcast %cst_36 : f32 to vector<16x16xf32>
    %cst_37 = arith.constant 0.000000e+00 : f32
    %127 = vector.broadcast %cst_37 : f32 to vector<16x16xf32>
    %cst_38 = arith.constant 0.000000e+00 : f32
    %128 = vector.broadcast %cst_38 : f32 to vector<16x16xf32>
    %cst_39 = arith.constant 0.000000e+00 : f32
    %129 = vector.broadcast %cst_39 : f32 to vector<16x16xf32>
    %c0_40 = arith.constant 0 : index
    %c0_41 = arith.constant 0 : index
    %c0_42 = arith.constant 0 : index
    %c0_43 = arith.constant 0 : index
    %130 = vector.load %arg3[%c0_40, %c0_41, %c0_42, %c0_43] : memref<1x4x16x16xf32, #tpu.memory_space<vmem>>, vector<1x1x16x16xf32>
    %131 = vector.shape_cast %130 : vector<1x1x16x16xf32> to vector<16x16xf32>
    %c4 = arith.constant 4 : index
    %132 = memref.load %arg2[%c4] : memref<128xf32, #tpu.memory_space<smem>>
    %133 = vector.broadcast %132 : f32 to vector<16x16xf32>
    %134 = arith.mulf %131, %133 : vector<16x16xf32>
    %135 = arith.addf %126, %134 : vector<16x16xf32>
    %c5 = arith.constant 5 : index
    %136 = memref.load %arg2[%c5] : memref<128xf32, #tpu.memory_space<smem>>
    %137 = vector.broadcast %136 : f32 to vector<16x16xf32>
    %138 = arith.mulf %131, %137 : vector<16x16xf32>
    %139 = arith.addf %127, %138 : vector<16x16xf32>
    %c6 = arith.constant 6 : index
    %140 = memref.load %arg2[%c6] : memref<128xf32, #tpu.memory_space<smem>>
    %141 = vector.broadcast %140 : f32 to vector<16x16xf32>
    %142 = arith.mulf %131, %141 : vector<16x16xf32>
    %143 = arith.addf %128, %142 : vector<16x16xf32>
    %c7 = arith.constant 7 : index
    %144 = memref.load %arg2[%c7] : memref<128xf32, #tpu.memory_space<smem>>
    %145 = vector.broadcast %144 : f32 to vector<16x16xf32>
    %146 = arith.mulf %131, %145 : vector<16x16xf32>
    %147 = arith.addf %129, %146 : vector<16x16xf32>
    %c0_44 = arith.constant 0 : index
    %c1_45 = arith.constant 1 : index
    %c0_46 = arith.constant 0 : index
    %c0_47 = arith.constant 0 : index
    %148 = vector.load %arg3[%c0_44, %c1_45, %c0_46, %c0_47] : memref<1x4x16x16xf32, #tpu.memory_space<vmem>>, vector<1x1x16x16xf32>
    %149 = vector.shape_cast %148 : vector<1x1x16x16xf32> to vector<16x16xf32>
    %c36 = arith.constant 36 : index
    %150 = memref.load %arg2[%c36] : memref<128xf32, #tpu.memory_space<smem>>
    %151 = vector.broadcast %150 : f32 to vector<16x16xf32>
    %152 = arith.mulf %149, %151 : vector<16x16xf32>
    %153 = arith.addf %135, %152 : vector<16x16xf32>
    %c37 = arith.constant 37 : index
    %154 = memref.load %arg2[%c37] : memref<128xf32, #tpu.memory_space<smem>>
    %155 = vector.broadcast %154 : f32 to vector<16x16xf32>
    %156 = arith.mulf %149, %155 : vector<16x16xf32>
    %157 = arith.addf %139, %156 : vector<16x16xf32>
    %c38 = arith.constant 38 : index
    %158 = memref.load %arg2[%c38] : memref<128xf32, #tpu.memory_space<smem>>
    %159 = vector.broadcast %158 : f32 to vector<16x16xf32>
    %160 = arith.mulf %149, %159 : vector<16x16xf32>
    %161 = arith.addf %143, %160 : vector<16x16xf32>
    %c39 = arith.constant 39 : index
    %162 = memref.load %arg2[%c39] : memref<128xf32, #tpu.memory_space<smem>>
    %163 = vector.broadcast %162 : f32 to vector<16x16xf32>
    %164 = arith.mulf %149, %163 : vector<16x16xf32>
    %165 = arith.addf %147, %164 : vector<16x16xf32>
    %c0_48 = arith.constant 0 : index
    %c2_49 = arith.constant 2 : index
    %c0_50 = arith.constant 0 : index
    %c0_51 = arith.constant 0 : index
    %166 = vector.load %arg3[%c0_48, %c2_49, %c0_50, %c0_51] : memref<1x4x16x16xf32, #tpu.memory_space<vmem>>, vector<1x1x16x16xf32>
    %167 = vector.shape_cast %166 : vector<1x1x16x16xf32> to vector<16x16xf32>
    %c68 = arith.constant 68 : index
    %168 = memref.load %arg2[%c68] : memref<128xf32, #tpu.memory_space<smem>>
    %169 = vector.broadcast %168 : f32 to vector<16x16xf32>
    %170 = arith.mulf %167, %169 : vector<16x16xf32>
    %171 = arith.addf %153, %170 : vector<16x16xf32>
    %c69 = arith.constant 69 : index
    %172 = memref.load %arg2[%c69] : memref<128xf32, #tpu.memory_space<smem>>
    %173 = vector.broadcast %172 : f32 to vector<16x16xf32>
    %174 = arith.mulf %167, %173 : vector<16x16xf32>
    %175 = arith.addf %157, %174 : vector<16x16xf32>
    %c70 = arith.constant 70 : index
    %176 = memref.load %arg2[%c70] : memref<128xf32, #tpu.memory_space<smem>>
    %177 = vector.broadcast %176 : f32 to vector<16x16xf32>
    %178 = arith.mulf %167, %177 : vector<16x16xf32>
    %179 = arith.addf %161, %178 : vector<16x16xf32>
    %c71 = arith.constant 71 : index
    %180 = memref.load %arg2[%c71] : memref<128xf32, #tpu.memory_space<smem>>
    %181 = vector.broadcast %180 : f32 to vector<16x16xf32>
    %182 = arith.mulf %167, %181 : vector<16x16xf32>
    %183 = arith.addf %165, %182 : vector<16x16xf32>
    %c0_52 = arith.constant 0 : index
    %c3_53 = arith.constant 3 : index
    %c0_54 = arith.constant 0 : index
    %c0_55 = arith.constant 0 : index
    %184 = vector.load %arg3[%c0_52, %c3_53, %c0_54, %c0_55] : memref<1x4x16x16xf32, #tpu.memory_space<vmem>>, vector<1x1x16x16xf32>
    %185 = vector.shape_cast %184 : vector<1x1x16x16xf32> to vector<16x16xf32>
    %c100 = arith.constant 100 : index
    %186 = memref.load %arg2[%c100] : memref<128xf32, #tpu.memory_space<smem>>
    %187 = vector.broadcast %186 : f32 to vector<16x16xf32>
    %188 = arith.mulf %185, %187 : vector<16x16xf32>
    %189 = arith.addf %171, %188 : vector<16x16xf32>
    %c101 = arith.constant 101 : index
    %190 = memref.load %arg2[%c101] : memref<128xf32, #tpu.memory_space<smem>>
    %191 = vector.broadcast %190 : f32 to vector<16x16xf32>
    %192 = arith.mulf %185, %191 : vector<16x16xf32>
    %193 = arith.addf %175, %192 : vector<16x16xf32>
    %c102 = arith.constant 102 : index
    %194 = memref.load %arg2[%c102] : memref<128xf32, #tpu.memory_space<smem>>
    %195 = vector.broadcast %194 : f32 to vector<16x16xf32>
    %196 = arith.mulf %185, %195 : vector<16x16xf32>
    %197 = arith.addf %179, %196 : vector<16x16xf32>
    %c103 = arith.constant 103 : index
    %198 = memref.load %arg2[%c103] : memref<128xf32, #tpu.memory_space<smem>>
    %199 = vector.broadcast %198 : f32 to vector<16x16xf32>
    %200 = arith.mulf %185, %199 : vector<16x16xf32>
    %201 = arith.addf %183, %200 : vector<16x16xf32>
    %cst_56 = arith.constant 0.000000e+00 : f32
    %202 = vector.broadcast %cst_56 : f32 to vector<16x64xf32>
    %cst_57 = arith.constant dense<0.000000e+00> : vector<16x64xf32>
    %203 = tpu.matmul %189, %10, %cst_57 {dimension_numbers = #tpu.dot_dimension_numbers<[1], [0], [0], [1], [0, 0, 1, 1], [], []>} : vector<16x16xf32>, vector<16x64xf32>, vector<16x64xf32> -> vector<16x64xf32>
    %204 = arith.addf %202, %203 : vector<16x64xf32>
    %cst_58 = arith.constant dense<0.000000e+00> : vector<16x64xf32>
    %205 = tpu.matmul %193, %19, %cst_58 {dimension_numbers = #tpu.dot_dimension_numbers<[1], [0], [0], [1], [0, 0, 1, 1], [], []>} : vector<16x16xf32>, vector<16x64xf32>, vector<16x64xf32> -> vector<16x64xf32>
    %206 = arith.addf %204, %205 : vector<16x64xf32>
    %cst_59 = arith.constant dense<0.000000e+00> : vector<16x64xf32>
    %207 = tpu.matmul %197, %28, %cst_59 {dimension_numbers = #tpu.dot_dimension_numbers<[1], [0], [0], [1], [0, 0, 1, 1], [], []>} : vector<16x16xf32>, vector<16x64xf32>, vector<16x64xf32> -> vector<16x64xf32>
    %208 = arith.addf %206, %207 : vector<16x64xf32>
    %cst_60 = arith.constant dense<0.000000e+00> : vector<16x64xf32>
    %209 = tpu.matmul %201, %37, %cst_60 {dimension_numbers = #tpu.dot_dimension_numbers<[1], [0], [0], [1], [0, 0, 1, 1], [], []>} : vector<16x16xf32>, vector<16x64xf32>, vector<16x64xf32> -> vector<16x64xf32>
    %210 = arith.addf %208, %209 : vector<16x64xf32>
    %c0_61 = arith.constant 0 : index
    %c1_62 = arith.constant 1 : index
    %c0_63 = arith.constant 0 : index
    %c0_64 = arith.constant 0 : index
    %211 = vector.load %arg4[%c0_61, %c1_62, %c0_63, %c0_64] : memref<1x8x16x64xf32, #tpu.memory_space<vmem>>, vector<1x1x16x64xf32>
    %212 = vector.shape_cast %211 : vector<1x1x16x64xf32> to vector<16x64xf32>
    %213 = vector.shape_cast %210 : vector<16x64xf32> to vector<1x1x16x64xf32>
    tpu.vector_store %arg4[%c0_61, %c1_62, %c0_63, %c0_64], %213 {strides = array<i32>} : memref<1x8x16x64xf32, #tpu.memory_space<vmem>>, vector<1x1x16x64xf32>,
    %cst_65 = arith.constant 0.000000e+00 : f32
    %214 = vector.broadcast %cst_65 : f32 to vector<16x16xf32>
    %cst_66 = arith.constant 0.000000e+00 : f32
    %215 = vector.broadcast %cst_66 : f32 to vector<16x16xf32>
    %cst_67 = arith.constant 0.000000e+00 : f32
    %216 = vector.broadcast %cst_67 : f32 to vector<16x16xf32>
    %cst_68 = arith.constant 0.000000e+00 : f32
    %217 = vector.broadcast %cst_68 : f32 to vector<16x16xf32>
    %c0_69 = arith.constant 0 : index
    %c0_70 = arith.constant 0 : index
    %c0_71 = arith.constant 0 : index
    %c0_72 = arith.constant 0 : index
    %218 = vector.load %arg3[%c0_69, %c0_70, %c0_71, %c0_72] : memref<1x4x16x16xf32, #tpu.memory_space<vmem>>, vector<1x1x16x16xf32>
    %219 = vector.shape_cast %218 : vector<1x1x16x16xf32> to vector<16x16xf32>
    %c8 = arith.constant 8 : index
    %220 = memref.load %arg2[%c8] : memref<128xf32, #tpu.memory_space<smem>>
    %221 = vector.broadcast %220 : f32 to vector<16x16xf32>
    %222 = arith.mulf %219, %221 : vector<16x16xf32>
    %223 = arith.addf %214, %222 : vector<16x16xf32>
    %c9 = arith.constant 9 : index
    %224 = memref.load %arg2[%c9] : memref<128xf32, #tpu.memory_space<smem>>
    %225 = vector.broadcast %224 : f32 to vector<16x16xf32>
    %226 = arith.mulf %219, %225 : vector<16x16xf32>
    %227 = arith.addf %215, %226 : vector<16x16xf32>
    %c10 = arith.constant 10 : index
    %228 = memref.load %arg2[%c10] : memref<128xf32, #tpu.memory_space<smem>>
    %229 = vector.broadcast %228 : f32 to vector<16x16xf32>
    %230 = arith.mulf %219, %229 : vector<16x16xf32>
    %231 = arith.addf %216, %230 : vector<16x16xf32>
    %c11 = arith.constant 11 : index
    %232 = memref.load %arg2[%c11] : memref<128xf32, #tpu.memory_space<smem>>
    %233 = vector.broadcast %232 : f32 to vector<16x16xf32>
    %234 = arith.mulf %219, %233 : vector<16x16xf32>
    %235 = arith.addf %217, %234 : vector<16x16xf32>
    %c0_73 = arith.constant 0 : index
    %c1_74 = arith.constant 1 : index
    %c0_75 = arith.constant 0 : index
    %c0_76 = arith.constant 0 : index
    %236 = vector.load %arg3[%c0_73, %c1_74, %c0_75, %c0_76] : memref<1x4x16x16xf32, #tpu.memory_space<vmem>>, vector<1x1x16x16xf32>
    %237 = vector.shape_cast %236 : vector<1x1x16x16xf32> to vector<16x16xf32>
    %c40 = arith.constant 40 : index
    %238 = memref.load %arg2[%c40] : memref<128xf32, #tpu.memory_space<smem>>
    %239 = vector.broadcast %238 : f32 to vector<16x16xf32>
    %240 = arith.mulf %237, %239 : vector<16x16xf32>
    %241 = arith.addf %223, %240 : vector<16x16xf32>
    %c41 = arith.constant 41 : index
    %242 = memref.load %arg2[%c41] : memref<128xf32, #tpu.memory_space<smem>>
    %243 = vector.broadcast %242 : f32 to vector<16x16xf32>
    %244 = arith.mulf %237, %243 : vector<16x16xf32>
    %245 = arith.addf %227, %244 : vector<16x16xf32>
    %c42 = arith.constant 42 : index
    %246 = memref.load %arg2[%c42] : memref<128xf32, #tpu.memory_space<smem>>
    %247 = vector.broadcast %246 : f32 to vector<16x16xf32>
    %248 = arith.mulf %237, %247 : vector<16x16xf32>
    %249 = arith.addf %231, %248 : vector<16x16xf32>
    %c43 = arith.constant 43 : index
    %250 = memref.load %arg2[%c43] : memref<128xf32, #tpu.memory_space<smem>>
    %251 = vector.broadcast %250 : f32 to vector<16x16xf32>
    %252 = arith.mulf %237, %251 : vector<16x16xf32>
    %253 = arith.addf %235, %252 : vector<16x16xf32>
    %c0_77 = arith.constant 0 : index
    %c2_78 = arith.constant 2 : index
    %c0_79 = arith.constant 0 : index
    %c0_80 = arith.constant 0 : index
    %254 = vector.load %arg3[%c0_77, %c2_78, %c0_79, %c0_80] : memref<1x4x16x16xf32, #tpu.memory_space<vmem>>, vector<1x1x16x16xf32>
    %255 = vector.shape_cast %254 : vector<1x1x16x16xf32> to vector<16x16xf32>
    %c72 = arith.constant 72 : index
    %256 = memref.load %arg2[%c72] : memref<128xf32, #tpu.memory_space<smem>>
    %257 = vector.broadcast %256 : f32 to vector<16x16xf32>
    %258 = arith.mulf %255, %257 : vector<16x16xf32>
    %259 = arith.addf %241, %258 : vector<16x16xf32>
    %c73 = arith.constant 73 : index
    %260 = memref.load %arg2[%c73] : memref<128xf32, #tpu.memory_space<smem>>
    %261 = vector.broadcast %260 : f32 to vector<16x16xf32>
    %262 = arith.mulf %255, %261 : vector<16x16xf32>
    %263 = arith.addf %245, %262 : vector<16x16xf32>
    %c74 = arith.constant 74 : index
    %264 = memref.load %arg2[%c74] : memref<128xf32, #tpu.memory_space<smem>>
    %265 = vector.broadcast %264 : f32 to vector<16x16xf32>
    %266 = arith.mulf %255, %265 : vector<16x16xf32>
    %267 = arith.addf %249, %266 : vector<16x16xf32>
    %c75 = arith.constant 75 : index
    %268 = memref.load %arg2[%c75] : memref<128xf32, #tpu.memory_space<smem>>
    %269 = vector.broadcast %268 : f32 to vector<16x16xf32>
    %270 = arith.mulf %255, %269 : vector<16x16xf32>
    %271 = arith.addf %253, %270 : vector<16x16xf32>
    %c0_81 = arith.constant 0 : index
    %c3_82 = arith.constant 3 : index
    %c0_83 = arith.constant 0 : index
    %c0_84 = arith.constant 0 : index
    %272 = vector.load %arg3[%c0_81, %c3_82, %c0_83, %c0_84] : memref<1x4x16x16xf32, #tpu.memory_space<vmem>>, vector<1x1x16x16xf32>
    %273 = vector.shape_cast %272 : vector<1x1x16x16xf32> to vector<16x16xf32>
    %c104 = arith.constant 104 : index
    %274 = memref.load %arg2[%c104] : memref<128xf32, #tpu.memory_space<smem>>
    %275 = vector.broadcast %274 : f32 to vector<16x16xf32>
    %276 = arith.mulf %273, %275 : vector<16x16xf32>
    %277 = arith.addf %259, %276 : vector<16x16xf32>
    %c105 = arith.constant 105 : index
    %278 = memref.load %arg2[%c105] : memref<128xf32, #tpu.memory_space<smem>>
    %279 = vector.broadcast %278 : f32 to vector<16x16xf32>
    %280 = arith.mulf %273, %279 : vector<16x16xf32>
    %281 = arith.addf %263, %280 : vector<16x16xf32>
    %c106 = arith.constant 106 : index
    %282 = memref.load %arg2[%c106] : memref<128xf32, #tpu.memory_space<smem>>
    %283 = vector.broadcast %282 : f32 to vector<16x16xf32>
    %284 = arith.mulf %273, %283 : vector<16x16xf32>
    %285 = arith.addf %267, %284 : vector<16x16xf32>
    %c107 = arith.constant 107 : index
    %286 = memref.load %arg2[%c107] : memref<128xf32, #tpu.memory_space<smem>>
    %287 = vector.broadcast %286 : f32 to vector<16x16xf32>
    %288 = arith.mulf %273, %287 : vector<16x16xf32>
    %289 = arith.addf %271, %288 : vector<16x16xf32>
    %cst_85 = arith.constant 0.000000e+00 : f32
    %290 = vector.broadcast %cst_85 : f32 to vector<16x64xf32>
    %cst_86 = arith.constant dense<0.000000e+00> : vector<16x64xf32>
    %291 = tpu.matmul %277, %10, %cst_86 {dimension_numbers = #tpu.dot_dimension_numbers<[1], [0], [0], [1], [0, 0, 1, 1], [], []>} : vector<16x16xf32>, vector<16x64xf32>, vector<16x64xf32> -> vector<16x64xf32>
    %292 = arith.addf %290, %291 : vector<16x64xf32>
    %cst_87 = arith.constant dense<0.000000e+00> : vector<16x64xf32>
    %293 = tpu.matmul %281, %19, %cst_87 {dimension_numbers = #tpu.dot_dimension_numbers<[1], [0], [0], [1], [0, 0, 1, 1], [], []>} : vector<16x16xf32>, vector<16x64xf32>, vector<16x64xf32> -> vector<16x64xf32>
    %294 = arith.addf %292, %293 : vector<16x64xf32>
    %cst_88 = arith.constant dense<0.000000e+00> : vector<16x64xf32>
    %295 = tpu.matmul %285, %28, %cst_88 {dimension_numbers = #tpu.dot_dimension_numbers<[1], [0], [0], [1], [0, 0, 1, 1], [], []>} : vector<16x16xf32>, vector<16x64xf32>, vector<16x64xf32> -> vector<16x64xf32>
    %296 = arith.addf %294, %295 : vector<16x64xf32>
    %cst_89 = arith.constant dense<0.000000e+00> : vector<16x64xf32>
    %297 = tpu.matmul %289, %37, %cst_89 {dimension_numbers = #tpu.dot_dimension_numbers<[1], [0], [0], [1], [0, 0, 1, 1], [], []>} : vector<16x16xf32>, vector<16x64xf32>, vector<16x64xf32> -> vector<16x64xf32>
    %298 = arith.addf %296, %297 : vector<16x64xf32>
    %c0_90 = arith.constant 0 : index
    %c2_91 = arith.constant 2 : index
    %c0_92 = arith.constant 0 : index
    %c0_93 = arith.constant 0 : index
    %299 = vector.load %arg4[%c0_90, %c2_91, %c0_92, %c0_93] : memref<1x8x16x64xf32, #tpu.memory_space<vmem>>, vector<1x1x16x64xf32>
    %300 = vector.shape_cast %299 : vector<1x1x16x64xf32> to vector<16x64xf32>
    %301 = vector.shape_cast %298 : vector<16x64xf32> to vector<1x1x16x64xf32>
    tpu.vector_store %arg4[%c0_90, %c2_91, %c0_92, %c0_93], %301 {strides = array<i32>} : memref<1x8x16x64xf32, #tpu.memory_space<vmem>>, vector<1x1x16x64xf32>,
    %cst_94 = arith.constant 0.000000e+00 : f32
    %302 = vector.broadcast %cst_94 : f32 to vector<16x16xf32>
    %cst_95 = arith.constant 0.000000e+00 : f32
    %303 = vector.broadcast %cst_95 : f32 to vector<16x16xf32>
    %cst_96 = arith.constant 0.000000e+00 : f32
    %304 = vector.broadcast %cst_96 : f32 to vector<16x16xf32>
    %cst_97 = arith.constant 0.000000e+00 : f32
    %305 = vector.broadcast %cst_97 : f32 to vector<16x16xf32>
    %c0_98 = arith.constant 0 : index
    %c0_99 = arith.constant 0 : index
    %c0_100 = arith.constant 0 : index
    %c0_101 = arith.constant 0 : index
    %306 = vector.load %arg3[%c0_98, %c0_99, %c0_100, %c0_101] : memref<1x4x16x16xf32, #tpu.memory_space<vmem>>, vector<1x1x16x16xf32>
    %307 = vector.shape_cast %306 : vector<1x1x16x16xf32> to vector<16x16xf32>
    %c12 = arith.constant 12 : index
    %308 = memref.load %arg2[%c12] : memref<128xf32, #tpu.memory_space<smem>>
    %309 = vector.broadcast %308 : f32 to vector<16x16xf32>
    %310 = arith.mulf %307, %309 : vector<16x16xf32>
    %311 = arith.addf %302, %310 : vector<16x16xf32>
    %c13 = arith.constant 13 : index
    %312 = memref.load %arg2[%c13] : memref<128xf32, #tpu.memory_space<smem>>
    %313 = vector.broadcast %312 : f32 to vector<16x16xf32>
    %314 = arith.mulf %307, %313 : vector<16x16xf32>
    %315 = arith.addf %303, %314 : vector<16x16xf32>
    %c14 = arith.constant 14 : index
    %316 = memref.load %arg2[%c14] : memref<128xf32, #tpu.memory_space<smem>>
    %317 = vector.broadcast %316 : f32 to vector<16x16xf32>
    %318 = arith.mulf %307, %317 : vector<16x16xf32>
    %319 = arith.addf %304, %318 : vector<16x16xf32>
    %c15 = arith.constant 15 : index
    %320 = memref.load %arg2[%c15] : memref<128xf32, #tpu.memory_space<smem>>
    %321 = vector.broadcast %320 : f32 to vector<16x16xf32>
    %322 = arith.mulf %307, %321 : vector<16x16xf32>
    %323 = arith.addf %305, %322 : vector<16x16xf32>
    %c0_102 = arith.constant 0 : index
    %c1_103 = arith.constant 1 : index
    %c0_104 = arith.constant 0 : index
    %c0_105 = arith.constant 0 : index
    %324 = vector.load %arg3[%c0_102, %c1_103, %c0_104, %c0_105] : memref<1x4x16x16xf32, #tpu.memory_space<vmem>>, vector<1x1x16x16xf32>
    %325 = vector.shape_cast %324 : vector<1x1x16x16xf32> to vector<16x16xf32>
    %c44 = arith.constant 44 : index
    %326 = memref.load %arg2[%c44] : memref<128xf32, #tpu.memory_space<smem>>
    %327 = vector.broadcast %326 : f32 to vector<16x16xf32>
    %328 = arith.mulf %325, %327 : vector<16x16xf32>
    %329 = arith.addf %311, %328 : vector<16x16xf32>
    %c45 = arith.constant 45 : index
    %330 = memref.load %arg2[%c45] : memref<128xf32, #tpu.memory_space<smem>>
    %331 = vector.broadcast %330 : f32 to vector<16x16xf32>
    %332 = arith.mulf %325, %331 : vector<16x16xf32>
    %333 = arith.addf %315, %332 : vector<16x16xf32>
    %c46 = arith.constant 46 : index
    %334 = memref.load %arg2[%c46] : memref<128xf32, #tpu.memory_space<smem>>
    %335 = vector.broadcast %334 : f32 to vector<16x16xf32>
    %336 = arith.mulf %325, %335 : vector<16x16xf32>
    %337 = arith.addf %319, %336 : vector<16x16xf32>
    %c47 = arith.constant 47 : index
    %338 = memref.load %arg2[%c47] : memref<128xf32, #tpu.memory_space<smem>>
    %339 = vector.broadcast %338 : f32 to vector<16x16xf32>
    %340 = arith.mulf %325, %339 : vector<16x16xf32>
    %341 = arith.addf %323, %340 : vector<16x16xf32>
    %c0_106 = arith.constant 0 : index
    %c2_107 = arith.constant 2 : index
    %c0_108 = arith.constant 0 : index
    %c0_109 = arith.constant 0 : index
    %342 = vector.load %arg3[%c0_106, %c2_107, %c0_108, %c0_109] : memref<1x4x16x16xf32, #tpu.memory_space<vmem>>, vector<1x1x16x16xf32>
    %343 = vector.shape_cast %342 : vector<1x1x16x16xf32> to vector<16x16xf32>
    %c76 = arith.constant 76 : index
    %344 = memref.load %arg2[%c76] : memref<128xf32, #tpu.memory_space<smem>>
    %345 = vector.broadcast %344 : f32 to vector<16x16xf32>
    %346 = arith.mulf %343, %345 : vector<16x16xf32>
    %347 = arith.addf %329, %346 : vector<16x16xf32>
    %c77 = arith.constant 77 : index
    %348 = memref.load %arg2[%c77] : memref<128xf32, #tpu.memory_space<smem>>
    %349 = vector.broadcast %348 : f32 to vector<16x16xf32>
    %350 = arith.mulf %343, %349 : vector<16x16xf32>
    %351 = arith.addf %333, %350 : vector<16x16xf32>
    %c78 = arith.constant 78 : index
    %352 = memref.load %arg2[%c78] : memref<128xf32, #tpu.memory_space<smem>>
    %353 = vector.broadcast %352 : f32 to vector<16x16xf32>
    %354 = arith.mulf %343, %353 : vector<16x16xf32>
    %355 = arith.addf %337, %354 : vector<16x16xf32>
    %c79 = arith.constant 79 : index
    %356 = memref.load %arg2[%c79] : memref<128xf32, #tpu.memory_space<smem>>
    %357 = vector.broadcast %356 : f32 to vector<16x16xf32>
    %358 = arith.mulf %343, %357 : vector<16x16xf32>
    %359 = arith.addf %341, %358 : vector<16x16xf32>
    %c0_110 = arith.constant 0 : index
    %c3_111 = arith.constant 3 : index
    %c0_112 = arith.constant 0 : index
    %c0_113 = arith.constant 0 : index
    %360 = vector.load %arg3[%c0_110, %c3_111, %c0_112, %c0_113] : memref<1x4x16x16xf32, #tpu.memory_space<vmem>>, vector<1x1x16x16xf32>
    %361 = vector.shape_cast %360 : vector<1x1x16x16xf32> to vector<16x16xf32>
    %c108 = arith.constant 108 : index
    %362 = memref.load %arg2[%c108] : memref<128xf32, #tpu.memory_space<smem>>
    %363 = vector.broadcast %362 : f32 to vector<16x16xf32>
    %364 = arith.mulf %361, %363 : vector<16x16xf32>
    %365 = arith.addf %347, %364 : vector<16x16xf32>
    %c109 = arith.constant 109 : index
    %366 = memref.load %arg2[%c109] : memref<128xf32, #tpu.memory_space<smem>>
    %367 = vector.broadcast %366 : f32 to vector<16x16xf32>
    %368 = arith.mulf %361, %367 : vector<16x16xf32>
    %369 = arith.addf %351, %368 : vector<16x16xf32>
    %c110 = arith.constant 110 : index
    %370 = memref.load %arg2[%c110] : memref<128xf32, #tpu.memory_space<smem>>
    %371 = vector.broadcast %370 : f32 to vector<16x16xf32>
    %372 = arith.mulf %361, %371 : vector<16x16xf32>
    %373 = arith.addf %355, %372 : vector<16x16xf32>
    %c111 = arith.constant 111 : index
    %374 = memref.load %arg2[%c111] : memref<128xf32, #tpu.memory_space<smem>>
    %375 = vector.broadcast %374 : f32 to vector<16x16xf32>
    %376 = arith.mulf %361, %375 : vector<16x16xf32>
    %377 = arith.addf %359, %376 : vector<16x16xf32>
    %cst_114 = arith.constant 0.000000e+00 : f32
    %378 = vector.broadcast %cst_114 : f32 to vector<16x64xf32>
    %cst_115 = arith.constant dense<0.000000e+00> : vector<16x64xf32>
    %379 = tpu.matmul %365, %10, %cst_115 {dimension_numbers = #tpu.dot_dimension_numbers<[1], [0], [0], [1], [0, 0, 1, 1], [], []>} : vector<16x16xf32>, vector<16x64xf32>, vector<16x64xf32> -> vector<16x64xf32>
    %380 = arith.addf %378, %379 : vector<16x64xf32>
    %cst_116 = arith.constant dense<0.000000e+00> : vector<16x64xf32>
    %381 = tpu.matmul %369, %19, %cst_116 {dimension_numbers = #tpu.dot_dimension_numbers<[1], [0], [0], [1], [0, 0, 1, 1], [], []>} : vector<16x16xf32>, vector<16x64xf32>, vector<16x64xf32> -> vector<16x64xf32>
    %382 = arith.addf %380, %381 : vector<16x64xf32>
    %cst_117 = arith.constant dense<0.000000e+00> : vector<16x64xf32>
    %383 = tpu.matmul %373, %28, %cst_117 {dimension_numbers = #tpu.dot_dimension_numbers<[1], [0], [0], [1], [0, 0, 1, 1], [], []>} : vector<16x16xf32>, vector<16x64xf32>, vector<16x64xf32> -> vector<16x64xf32>
    %384 = arith.addf %382, %383 : vector<16x64xf32>
    %cst_118 = arith.constant dense<0.000000e+00> : vector<16x64xf32>
    %385 = tpu.matmul %377, %37, %cst_118 {dimension_numbers = #tpu.dot_dimension_numbers<[1], [0], [0], [1], [0, 0, 1, 1], [], []>} : vector<16x16xf32>, vector<16x64xf32>, vector<16x64xf32> -> vector<16x64xf32>
    %386 = arith.addf %384, %385 : vector<16x64xf32>
    %c0_119 = arith.constant 0 : index
    %c3_120 = arith.constant 3 : index
    %c0_121 = arith.constant 0 : index
    %c0_122 = arith.constant 0 : index
    %387 = vector.load %arg4[%c0_119, %c3_120, %c0_121, %c0_122] : memref<1x8x16x64xf32, #tpu.memory_space<vmem>>, vector<1x1x16x64xf32>
    %388 = vector.shape_cast %387 : vector<1x1x16x64xf32> to vector<16x64xf32>
    %389 = vector.shape_cast %386 : vector<16x64xf32> to vector<1x1x16x64xf32>
    tpu.vector_store %arg4[%c0_119, %c3_120, %c0_121, %c0_122], %389 {strides = array<i32>} : memref<1x8x16x64xf32, #tpu.memory_space<vmem>>, vector<1x1x16x64xf32>,
    %cst_123 = arith.constant 0.000000e+00 : f32
    %390 = vector.broadcast %cst_123 : f32 to vector<16x16xf32>
    %cst_124 = arith.constant 0.000000e+00 : f32
    %391 = vector.broadcast %cst_124 : f32 to vector<16x16xf32>
    %cst_125 = arith.constant 0.000000e+00 : f32
    %392 = vector.broadcast %cst_125 : f32 to vector<16x16xf32>
    %cst_126 = arith.constant 0.000000e+00 : f32
    %393 = vector.broadcast %cst_126 : f32 to vector<16x16xf32>
    %c0_127 = arith.constant 0 : index
    %c0_128 = arith.constant 0 : index
    %c0_129 = arith.constant 0 : index
    %c0_130 = arith.constant 0 : index
    %394 = vector.load %arg3[%c0_127, %c0_128, %c0_129, %c0_130] : memref<1x4x16x16xf32, #tpu.memory_space<vmem>>, vector<1x1x16x16xf32>
    %395 = vector.shape_cast %394 : vector<1x1x16x16xf32> to vector<16x16xf32>
    %c16 = arith.constant 16 : index
    %396 = memref.load %arg2[%c16] : memref<128xf32, #tpu.memory_space<smem>>
    %397 = vector.broadcast %396 : f32 to vector<16x16xf32>
    %398 = arith.mulf %395, %397 : vector<16x16xf32>
    %399 = arith.addf %390, %398 : vector<16x16xf32>
    %c17 = arith.constant 17 : index
    %400 = memref.load %arg2[%c17] : memref<128xf32, #tpu.memory_space<smem>>
    %401 = vector.broadcast %400 : f32 to vector<16x16xf32>
    %402 = arith.mulf %395, %401 : vector<16x16xf32>
    %403 = arith.addf %391, %402 : vector<16x16xf32>
    %c18 = arith.constant 18 : index
    %404 = memref.load %arg2[%c18] : memref<128xf32, #tpu.memory_space<smem>>
    %405 = vector.broadcast %404 : f32 to vector<16x16xf32>
    %406 = arith.mulf %395, %405 : vector<16x16xf32>
    %407 = arith.addf %392, %406 : vector<16x16xf32>
    %c19 = arith.constant 19 : index
    %408 = memref.load %arg2[%c19] : memref<128xf32, #tpu.memory_space<smem>>
    %409 = vector.broadcast %408 : f32 to vector<16x16xf32>
    %410 = arith.mulf %395, %409 : vector<16x16xf32>
    %411 = arith.addf %393, %410 : vector<16x16xf32>
    %c0_131 = arith.constant 0 : index
    %c1_132 = arith.constant 1 : index
    %c0_133 = arith.constant 0 : index
    %c0_134 = arith.constant 0 : index
    %412 = vector.load %arg3[%c0_131, %c1_132, %c0_133, %c0_134] : memref<1x4x16x16xf32, #tpu.memory_space<vmem>>, vector<1x1x16x16xf32>
    %413 = vector.shape_cast %412 : vector<1x1x16x16xf32> to vector<16x16xf32>
    %c48 = arith.constant 48 : index
    %414 = memref.load %arg2[%c48] : memref<128xf32, #tpu.memory_space<smem>>
    %415 = vector.broadcast %414 : f32 to vector<16x16xf32>
    %416 = arith.mulf %413, %415 : vector<16x16xf32>
    %417 = arith.addf %399, %416 : vector<16x16xf32>
    %c49 = arith.constant 49 : index
    %418 = memref.load %arg2[%c49] : memref<128xf32, #tpu.memory_space<smem>>
    %419 = vector.broadcast %418 : f32 to vector<16x16xf32>
    %420 = arith.mulf %413, %419 : vector<16x16xf32>
    %421 = arith.addf %403, %420 : vector<16x16xf32>
    %c50 = arith.constant 50 : index
    %422 = memref.load %arg2[%c50] : memref<128xf32, #tpu.memory_space<smem>>
    %423 = vector.broadcast %422 : f32 to vector<16x16xf32>
    %424 = arith.mulf %413, %423 : vector<16x16xf32>
    %425 = arith.addf %407, %424 : vector<16x16xf32>
    %c51 = arith.constant 51 : index
    %426 = memref.load %arg2[%c51] : memref<128xf32, #tpu.memory_space<smem>>
    %427 = vector.broadcast %426 : f32 to vector<16x16xf32>
    %428 = arith.mulf %413, %427 : vector<16x16xf32>
    %429 = arith.addf %411, %428 : vector<16x16xf32>
    %c0_135 = arith.constant 0 : index
    %c2_136 = arith.constant 2 : index
    %c0_137 = arith.constant 0 : index
    %c0_138 = arith.constant 0 : index
    %430 = vector.load %arg3[%c0_135, %c2_136, %c0_137, %c0_138] : memref<1x4x16x16xf32, #tpu.memory_space<vmem>>, vector<1x1x16x16xf32>
    %431 = vector.shape_cast %430 : vector<1x1x16x16xf32> to vector<16x16xf32>
    %c80 = arith.constant 80 : index
    %432 = memref.load %arg2[%c80] : memref<128xf32, #tpu.memory_space<smem>>
    %433 = vector.broadcast %432 : f32 to vector<16x16xf32>
    %434 = arith.mulf %431, %433 : vector<16x16xf32>
    %435 = arith.addf %417, %434 : vector<16x16xf32>
    %c81 = arith.constant 81 : index
    %436 = memref.load %arg2[%c81] : memref<128xf32, #tpu.memory_space<smem>>
    %437 = vector.broadcast %436 : f32 to vector<16x16xf32>
    %438 = arith.mulf %431, %437 : vector<16x16xf32>
    %439 = arith.addf %421, %438 : vector<16x16xf32>
    %c82 = arith.constant 82 : index
    %440 = memref.load %arg2[%c82] : memref<128xf32, #tpu.memory_space<smem>>
    %441 = vector.broadcast %440 : f32 to vector<16x16xf32>
    %442 = arith.mulf %431, %441 : vector<16x16xf32>
    %443 = arith.addf %425, %442 : vector<16x16xf32>
    %c83 = arith.constant 83 : index
    %444 = memref.load %arg2[%c83] : memref<128xf32, #tpu.memory_space<smem>>
    %445 = vector.broadcast %444 : f32 to vector<16x16xf32>
    %446 = arith.mulf %431, %445 : vector<16x16xf32>
    %447 = arith.addf %429, %446 : vector<16x16xf32>
    %c0_139 = arith.constant 0 : index
    %c3_140 = arith.constant 3 : index
    %c0_141 = arith.constant 0 : index
    %c0_142 = arith.constant 0 : index
    %448 = vector.load %arg3[%c0_139, %c3_140, %c0_141, %c0_142] : memref<1x4x16x16xf32, #tpu.memory_space<vmem>>, vector<1x1x16x16xf32>
    %449 = vector.shape_cast %448 : vector<1x1x16x16xf32> to vector<16x16xf32>
    %c112 = arith.constant 112 : index
    %450 = memref.load %arg2[%c112] : memref<128xf32, #tpu.memory_space<smem>>
    %451 = vector.broadcast %450 : f32 to vector<16x16xf32>
    %452 = arith.mulf %449, %451 : vector<16x16xf32>
    %453 = arith.addf %435, %452 : vector<16x16xf32>
    %c113 = arith.constant 113 : index
    %454 = memref.load %arg2[%c113] : memref<128xf32, #tpu.memory_space<smem>>
    %455 = vector.broadcast %454 : f32 to vector<16x16xf32>
    %456 = arith.mulf %449, %455 : vector<16x16xf32>
    %457 = arith.addf %439, %456 : vector<16x16xf32>
    %c114 = arith.constant 114 : index
    %458 = memref.load %arg2[%c114] : memref<128xf32, #tpu.memory_space<smem>>
    %459 = vector.broadcast %458 : f32 to vector<16x16xf32>
    %460 = arith.mulf %449, %459 : vector<16x16xf32>
    %461 = arith.addf %443, %460 : vector<16x16xf32>
    %c115 = arith.constant 115 : index
    %462 = memref.load %arg2[%c115] : memref<128xf32, #tpu.memory_space<smem>>
    %463 = vector.broadcast %462 : f32 to vector<16x16xf32>
    %464 = arith.mulf %449, %463 : vector<16x16xf32>
    %465 = arith.addf %447, %464 : vector<16x16xf32>
    %cst_143 = arith.constant 0.000000e+00 : f32
    %466 = vector.broadcast %cst_143 : f32 to vector<16x64xf32>
    %cst_144 = arith.constant dense<0.000000e+00> : vector<16x64xf32>
    %467 = tpu.matmul %453, %10, %cst_144 {dimension_numbers = #tpu.dot_dimension_numbers<[1], [0], [0], [1], [0, 0, 1, 1], [], []>} : vector<16x16xf32>, vector<16x64xf32>, vector<16x64xf32> -> vector<16x64xf32>
    %468 = arith.addf %466, %467 : vector<16x64xf32>
    %cst_145 = arith.constant dense<0.000000e+00> : vector<16x64xf32>
    %469 = tpu.matmul %457, %19, %cst_145 {dimension_numbers = #tpu.dot_dimension_numbers<[1], [0], [0], [1], [0, 0, 1, 1], [], []>} : vector<16x16xf32>, vector<16x64xf32>, vector<16x64xf32> -> vector<16x64xf32>
    %470 = arith.addf %468, %469 : vector<16x64xf32>
    %cst_146 = arith.constant dense<0.000000e+00> : vector<16x64xf32>
    %471 = tpu.matmul %461, %28, %cst_146 {dimension_numbers = #tpu.dot_dimension_numbers<[1], [0], [0], [1], [0, 0, 1, 1], [], []>} : vector<16x16xf32>, vector<16x64xf32>, vector<16x64xf32> -> vector<16x64xf32>
    %472 = arith.addf %470, %471 : vector<16x64xf32>
    %cst_147 = arith.constant dense<0.000000e+00> : vector<16x64xf32>
    %473 = tpu.matmul %465, %37, %cst_147 {dimension_numbers = #tpu.dot_dimension_numbers<[1], [0], [0], [1], [0, 0, 1, 1], [], []>} : vector<16x16xf32>, vector<16x64xf32>, vector<16x64xf32> -> vector<16x64xf32>
    %474 = arith.addf %472, %473 : vector<16x64xf32>
    %c0_148 = arith.constant 0 : index
    %c4_149 = arith.constant 4 : index
    %c0_150 = arith.constant 0 : index
    %c0_151 = arith.constant 0 : index
    %475 = vector.load %arg4[%c0_148, %c4_149, %c0_150, %c0_151] : memref<1x8x16x64xf32, #tpu.memory_space<vmem>>, vector<1x1x16x64xf32>
    %476 = vector.shape_cast %475 : vector<1x1x16x64xf32> to vector<16x64xf32>
    %477 = vector.shape_cast %474 : vector<16x64xf32> to vector<1x1x16x64xf32>
    tpu.vector_store %arg4[%c0_148, %c4_149, %c0_150, %c0_151], %477 {strides = array<i32>} : memref<1x8x16x64xf32, #tpu.memory_space<vmem>>, vector<1x1x16x64xf32>,
    %cst_152 = arith.constant 0.000000e+00 : f32
    %478 = vector.broadcast %cst_152 : f32 to vector<16x16xf32>
    %cst_153 = arith.constant 0.000000e+00 : f32
    %479 = vector.broadcast %cst_153 : f32 to vector<16x16xf32>
    %cst_154 = arith.constant 0.000000e+00 : f32
    %480 = vector.broadcast %cst_154 : f32 to vector<16x16xf32>
    %cst_155 = arith.constant 0.000000e+00 : f32
    %481 = vector.broadcast %cst_155 : f32 to vector<16x16xf32>
    %c0_156 = arith.constant 0 : index
    %c0_157 = arith.constant 0 : index
    %c0_158 = arith.constant 0 : index
    %c0_159 = arith.constant 0 : index
    %482 = vector.load %arg3[%c0_156, %c0_157, %c0_158, %c0_159] : memref<1x4x16x16xf32, #tpu.memory_space<vmem>>, vector<1x1x16x16xf32>
    %483 = vector.shape_cast %482 : vector<1x1x16x16xf32> to vector<16x16xf32>
    %c20 = arith.constant 20 : index
    %484 = memref.load %arg2[%c20] : memref<128xf32, #tpu.memory_space<smem>>
    %485 = vector.broadcast %484 : f32 to vector<16x16xf32>
    %486 = arith.mulf %483, %485 : vector<16x16xf32>
    %487 = arith.addf %478, %486 : vector<16x16xf32>
    %c21 = arith.constant 21 : index
    %488 = memref.load %arg2[%c21] : memref<128xf32, #tpu.memory_space<smem>>
    %489 = vector.broadcast %488 : f32 to vector<16x16xf32>
    %490 = arith.mulf %483, %489 : vector<16x16xf32>
    %491 = arith.addf %479, %490 : vector<16x16xf32>
    %c22 = arith.constant 22 : index
    %492 = memref.load %arg2[%c22] : memref<128xf32, #tpu.memory_space<smem>>
    %493 = vector.broadcast %492 : f32 to vector<16x16xf32>
    %494 = arith.mulf %483, %493 : vector<16x16xf32>
    %495 = arith.addf %480, %494 : vector<16x16xf32>
    %c23 = arith.constant 23 : index
    %496 = memref.load %arg2[%c23] : memref<128xf32, #tpu.memory_space<smem>>
    %497 = vector.broadcast %496 : f32 to vector<16x16xf32>
    %498 = arith.mulf %483, %497 : vector<16x16xf32>
    %499 = arith.addf %481, %498 : vector<16x16xf32>
    %c0_160 = arith.constant 0 : index
    %c1_161 = arith.constant 1 : index
    %c0_162 = arith.constant 0 : index
    %c0_163 = arith.constant 0 : index
    %500 = vector.load %arg3[%c0_160, %c1_161, %c0_162, %c0_163] : memref<1x4x16x16xf32, #tpu.memory_space<vmem>>, vector<1x1x16x16xf32>
    %501 = vector.shape_cast %500 : vector<1x1x16x16xf32> to vector<16x16xf32>
    %c52 = arith.constant 52 : index
    %502 = memref.load %arg2[%c52] : memref<128xf32, #tpu.memory_space<smem>>
    %503 = vector.broadcast %502 : f32 to vector<16x16xf32>
    %504 = arith.mulf %501, %503 : vector<16x16xf32>
    %505 = arith.addf %487, %504 : vector<16x16xf32>
    %c53 = arith.constant 53 : index
    %506 = memref.load %arg2[%c53] : memref<128xf32, #tpu.memory_space<smem>>
    %507 = vector.broadcast %506 : f32 to vector<16x16xf32>
    %508 = arith.mulf %501, %507 : vector<16x16xf32>
    %509 = arith.addf %491, %508 : vector<16x16xf32>
    %c54 = arith.constant 54 : index
    %510 = memref.load %arg2[%c54] : memref<128xf32, #tpu.memory_space<smem>>
    %511 = vector.broadcast %510 : f32 to vector<16x16xf32>
    %512 = arith.mulf %501, %511 : vector<16x16xf32>
    %513 = arith.addf %495, %512 : vector<16x16xf32>
    %c55 = arith.constant 55 : index
    %514 = memref.load %arg2[%c55] : memref<128xf32, #tpu.memory_space<smem>>
    %515 = vector.broadcast %514 : f32 to vector<16x16xf32>
    %516 = arith.mulf %501, %515 : vector<16x16xf32>
    %517 = arith.addf %499, %516 : vector<16x16xf32>
    %c0_164 = arith.constant 0 : index
    %c2_165 = arith.constant 2 : index
    %c0_166 = arith.constant 0 : index
    %c0_167 = arith.constant 0 : index
    %518 = vector.load %arg3[%c0_164, %c2_165, %c0_166, %c0_167] : memref<1x4x16x16xf32, #tpu.memory_space<vmem>>, vector<1x1x16x16xf32>
    %519 = vector.shape_cast %518 : vector<1x1x16x16xf32> to vector<16x16xf32>
    %c84 = arith.constant 84 : index
    %520 = memref.load %arg2[%c84] : memref<128xf32, #tpu.memory_space<smem>>
    %521 = vector.broadcast %520 : f32 to vector<16x16xf32>
    %522 = arith.mulf %519, %521 : vector<16x16xf32>
    %523 = arith.addf %505, %522 : vector<16x16xf32>
    %c85 = arith.constant 85 : index
    %524 = memref.load %arg2[%c85] : memref<128xf32, #tpu.memory_space<smem>>
    %525 = vector.broadcast %524 : f32 to vector<16x16xf32>
    %526 = arith.mulf %519, %525 : vector<16x16xf32>
    %527 = arith.addf %509, %526 : vector<16x16xf32>
    %c86 = arith.constant 86 : index
    %528 = memref.load %arg2[%c86] : memref<128xf32, #tpu.memory_space<smem>>
    %529 = vector.broadcast %528 : f32 to vector<16x16xf32>
    %530 = arith.mulf %519, %529 : vector<16x16xf32>
    %531 = arith.addf %513, %530 : vector<16x16xf32>
    %c87 = arith.constant 87 : index
    %532 = memref.load %arg2[%c87] : memref<128xf32, #tpu.memory_space<smem>>
    %533 = vector.broadcast %532 : f32 to vector<16x16xf32>
    %534 = arith.mulf %519, %533 : vector<16x16xf32>
    %535 = arith.addf %517, %534 : vector<16x16xf32>
    %c0_168 = arith.constant 0 : index
    %c3_169 = arith.constant 3 : index
    %c0_170 = arith.constant 0 : index
    %c0_171 = arith.constant 0 : index
    %536 = vector.load %arg3[%c0_168, %c3_169, %c0_170, %c0_171] : memref<1x4x16x16xf32, #tpu.memory_space<vmem>>, vector<1x1x16x16xf32>
    %537 = vector.shape_cast %536 : vector<1x1x16x16xf32> to vector<16x16xf32>
    %c116 = arith.constant 116 : index
    %538 = memref.load %arg2[%c116] : memref<128xf32, #tpu.memory_space<smem>>
    %539 = vector.broadcast %538 : f32 to vector<16x16xf32>
    %540 = arith.mulf %537, %539 : vector<16x16xf32>
    %541 = arith.addf %523, %540 : vector<16x16xf32>
    %c117 = arith.constant 117 : index
    %542 = memref.load %arg2[%c117] : memref<128xf32, #tpu.memory_space<smem>>
    %543 = vector.broadcast %542 : f32 to vector<16x16xf32>
    %544 = arith.mulf %537, %543 : vector<16x16xf32>
    %545 = arith.addf %527, %544 : vector<16x16xf32>
    %c118 = arith.constant 118 : index
    %546 = memref.load %arg2[%c118] : memref<128xf32, #tpu.memory_space<smem>>
    %547 = vector.broadcast %546 : f32 to vector<16x16xf32>
    %548 = arith.mulf %537, %547 : vector<16x16xf32>
    %549 = arith.addf %531, %548 : vector<16x16xf32>
    %c119 = arith.constant 119 : index
    %550 = memref.load %arg2[%c119] : memref<128xf32, #tpu.memory_space<smem>>
    %551 = vector.broadcast %550 : f32 to vector<16x16xf32>
    %552 = arith.mulf %537, %551 : vector<16x16xf32>
    %553 = arith.addf %535, %552 : vector<16x16xf32>
    %cst_172 = arith.constant 0.000000e+00 : f32
    %554 = vector.broadcast %cst_172 : f32 to vector<16x64xf32>
    %cst_173 = arith.constant dense<0.000000e+00> : vector<16x64xf32>
    %555 = tpu.matmul %541, %10, %cst_173 {dimension_numbers = #tpu.dot_dimension_numbers<[1], [0], [0], [1], [0, 0, 1, 1], [], []>} : vector<16x16xf32>, vector<16x64xf32>, vector<16x64xf32> -> vector<16x64xf32>
    %556 = arith.addf %554, %555 : vector<16x64xf32>
    %cst_174 = arith.constant dense<0.000000e+00> : vector<16x64xf32>
    %557 = tpu.matmul %545, %19, %cst_174 {dimension_numbers = #tpu.dot_dimension_numbers<[1], [0], [0], [1], [0, 0, 1, 1], [], []>} : vector<16x16xf32>, vector<16x64xf32>, vector<16x64xf32> -> vector<16x64xf32>
    %558 = arith.addf %556, %557 : vector<16x64xf32>
    %cst_175 = arith.constant dense<0.000000e+00> : vector<16x64xf32>
    %559 = tpu.matmul %549, %28, %cst_175 {dimension_numbers = #tpu.dot_dimension_numbers<[1], [0], [0], [1], [0, 0, 1, 1], [], []>} : vector<16x16xf32>, vector<16x64xf32>, vector<16x64xf32> -> vector<16x64xf32>
    %560 = arith.addf %558, %559 : vector<16x64xf32>
    %cst_176 = arith.constant dense<0.000000e+00> : vector<16x64xf32>
    %561 = tpu.matmul %553, %37, %cst_176 {dimension_numbers = #tpu.dot_dimension_numbers<[1], [0], [0], [1], [0, 0, 1, 1], [], []>} : vector<16x16xf32>, vector<16x64xf32>, vector<16x64xf32> -> vector<16x64xf32>
    %562 = arith.addf %560, %561 : vector<16x64xf32>
    %c0_177 = arith.constant 0 : index
    %c5_178 = arith.constant 5 : index
    %c0_179 = arith.constant 0 : index
    %c0_180 = arith.constant 0 : index
    %563 = vector.load %arg4[%c0_177, %c5_178, %c0_179, %c0_180] : memref<1x8x16x64xf32, #tpu.memory_space<vmem>>, vector<1x1x16x64xf32>
    %564 = vector.shape_cast %563 : vector<1x1x16x64xf32> to vector<16x64xf32>
    %565 = vector.shape_cast %562 : vector<16x64xf32> to vector<1x1x16x64xf32>
    tpu.vector_store %arg4[%c0_177, %c5_178, %c0_179, %c0_180], %565 {strides = array<i32>} : memref<1x8x16x64xf32, #tpu.memory_space<vmem>>, vector<1x1x16x64xf32>,
    %cst_181 = arith.constant 0.000000e+00 : f32
    %566 = vector.broadcast %cst_181 : f32 to vector<16x16xf32>
    %cst_182 = arith.constant 0.000000e+00 : f32
    %567 = vector.broadcast %cst_182 : f32 to vector<16x16xf32>
    %cst_183 = arith.constant 0.000000e+00 : f32
    %568 = vector.broadcast %cst_183 : f32 to vector<16x16xf32>
    %cst_184 = arith.constant 0.000000e+00 : f32
    %569 = vector.broadcast %cst_184 : f32 to vector<16x16xf32>
    %c0_185 = arith.constant 0 : index
    %c0_186 = arith.constant 0 : index
    %c0_187 = arith.constant 0 : index
    %c0_188 = arith.constant 0 : index
    %570 = vector.load %arg3[%c0_185, %c0_186, %c0_187, %c0_188] : memref<1x4x16x16xf32, #tpu.memory_space<vmem>>, vector<1x1x16x16xf32>
    %571 = vector.shape_cast %570 : vector<1x1x16x16xf32> to vector<16x16xf32>
    %c24 = arith.constant 24 : index
    %572 = memref.load %arg2[%c24] : memref<128xf32, #tpu.memory_space<smem>>
    %573 = vector.broadcast %572 : f32 to vector<16x16xf32>
    %574 = arith.mulf %571, %573 : vector<16x16xf32>
    %575 = arith.addf %566, %574 : vector<16x16xf32>
    %c25 = arith.constant 25 : index
    %576 = memref.load %arg2[%c25] : memref<128xf32, #tpu.memory_space<smem>>
    %577 = vector.broadcast %576 : f32 to vector<16x16xf32>
    %578 = arith.mulf %571, %577 : vector<16x16xf32>
    %579 = arith.addf %567, %578 : vector<16x16xf32>
    %c26 = arith.constant 26 : index
    %580 = memref.load %arg2[%c26] : memref<128xf32, #tpu.memory_space<smem>>
    %581 = vector.broadcast %580 : f32 to vector<16x16xf32>
    %582 = arith.mulf %571, %581 : vector<16x16xf32>
    %583 = arith.addf %568, %582 : vector<16x16xf32>
    %c27 = arith.constant 27 : index
    %584 = memref.load %arg2[%c27] : memref<128xf32, #tpu.memory_space<smem>>
    %585 = vector.broadcast %584 : f32 to vector<16x16xf32>
    %586 = arith.mulf %571, %585 : vector<16x16xf32>
    %587 = arith.addf %569, %586 : vector<16x16xf32>
    %c0_189 = arith.constant 0 : index
    %c1_190 = arith.constant 1 : index
    %c0_191 = arith.constant 0 : index
    %c0_192 = arith.constant 0 : index
    %588 = vector.load %arg3[%c0_189, %c1_190, %c0_191, %c0_192] : memref<1x4x16x16xf32, #tpu.memory_space<vmem>>, vector<1x1x16x16xf32>
    %589 = vector.shape_cast %588 : vector<1x1x16x16xf32> to vector<16x16xf32>
    %c56 = arith.constant 56 : index
    %590 = memref.load %arg2[%c56] : memref<128xf32, #tpu.memory_space<smem>>
    %591 = vector.broadcast %590 : f32 to vector<16x16xf32>
    %592 = arith.mulf %589, %591 : vector<16x16xf32>
    %593 = arith.addf %575, %592 : vector<16x16xf32>
    %c57 = arith.constant 57 : index
    %594 = memref.load %arg2[%c57] : memref<128xf32, #tpu.memory_space<smem>>
    %595 = vector.broadcast %594 : f32 to vector<16x16xf32>
    %596 = arith.mulf %589, %595 : vector<16x16xf32>
    %597 = arith.addf %579, %596 : vector<16x16xf32>
    %c58 = arith.constant 58 : index
    %598 = memref.load %arg2[%c58] : memref<128xf32, #tpu.memory_space<smem>>
    %599 = vector.broadcast %598 : f32 to vector<16x16xf32>
    %600 = arith.mulf %589, %599 : vector<16x16xf32>
    %601 = arith.addf %583, %600 : vector<16x16xf32>
    %c59 = arith.constant 59 : index
    %602 = memref.load %arg2[%c59] : memref<128xf32, #tpu.memory_space<smem>>
    %603 = vector.broadcast %602 : f32 to vector<16x16xf32>
    %604 = arith.mulf %589, %603 : vector<16x16xf32>
    %605 = arith.addf %587, %604 : vector<16x16xf32>
    %c0_193 = arith.constant 0 : index
    %c2_194 = arith.constant 2 : index
    %c0_195 = arith.constant 0 : index
    %c0_196 = arith.constant 0 : index
    %606 = vector.load %arg3[%c0_193, %c2_194, %c0_195, %c0_196] : memref<1x4x16x16xf32, #tpu.memory_space<vmem>>, vector<1x1x16x16xf32>
    %607 = vector.shape_cast %606 : vector<1x1x16x16xf32> to vector<16x16xf32>
    %c88 = arith.constant 88 : index
    %608 = memref.load %arg2[%c88] : memref<128xf32, #tpu.memory_space<smem>>
    %609 = vector.broadcast %608 : f32 to vector<16x16xf32>
    %610 = arith.mulf %607, %609 : vector<16x16xf32>
    %611 = arith.addf %593, %610 : vector<16x16xf32>
    %c89 = arith.constant 89 : index
    %612 = memref.load %arg2[%c89] : memref<128xf32, #tpu.memory_space<smem>>
    %613 = vector.broadcast %612 : f32 to vector<16x16xf32>
    %614 = arith.mulf %607, %613 : vector<16x16xf32>
    %615 = arith.addf %597, %614 : vector<16x16xf32>
    %c90 = arith.constant 90 : index
    %616 = memref.load %arg2[%c90] : memref<128xf32, #tpu.memory_space<smem>>
    %617 = vector.broadcast %616 : f32 to vector<16x16xf32>
    %618 = arith.mulf %607, %617 : vector<16x16xf32>
    %619 = arith.addf %601, %618 : vector<16x16xf32>
    %c91 = arith.constant 91 : index
    %620 = memref.load %arg2[%c91] : memref<128xf32, #tpu.memory_space<smem>>
    %621 = vector.broadcast %620 : f32 to vector<16x16xf32>
    %622 = arith.mulf %607, %621 : vector<16x16xf32>
    %623 = arith.addf %605, %622 : vector<16x16xf32>
    %c0_197 = arith.constant 0 : index
    %c3_198 = arith.constant 3 : index
    %c0_199 = arith.constant 0 : index
    %c0_200 = arith.constant 0 : index
    %624 = vector.load %arg3[%c0_197, %c3_198, %c0_199, %c0_200] : memref<1x4x16x16xf32, #tpu.memory_space<vmem>>, vector<1x1x16x16xf32>
    %625 = vector.shape_cast %624 : vector<1x1x16x16xf32> to vector<16x16xf32>
    %c120 = arith.constant 120 : index
    %626 = memref.load %arg2[%c120] : memref<128xf32, #tpu.memory_space<smem>>
    %627 = vector.broadcast %626 : f32 to vector<16x16xf32>
    %628 = arith.mulf %625, %627 : vector<16x16xf32>
    %629 = arith.addf %611, %628 : vector<16x16xf32>
    %c121 = arith.constant 121 : index
    %630 = memref.load %arg2[%c121] : memref<128xf32, #tpu.memory_space<smem>>
    %631 = vector.broadcast %630 : f32 to vector<16x16xf32>
    %632 = arith.mulf %625, %631 : vector<16x16xf32>
    %633 = arith.addf %615, %632 : vector<16x16xf32>
    %c122 = arith.constant 122 : index
    %634 = memref.load %arg2[%c122] : memref<128xf32, #tpu.memory_space<smem>>
    %635 = vector.broadcast %634 : f32 to vector<16x16xf32>
    %636 = arith.mulf %625, %635 : vector<16x16xf32>
    %637 = arith.addf %619, %636 : vector<16x16xf32>
    %c123 = arith.constant 123 : index
    %638 = memref.load %arg2[%c123] : memref<128xf32, #tpu.memory_space<smem>>
    %639 = vector.broadcast %638 : f32 to vector<16x16xf32>
    %640 = arith.mulf %625, %639 : vector<16x16xf32>
    %641 = arith.addf %623, %640 : vector<16x16xf32>
    %cst_201 = arith.constant 0.000000e+00 : f32
    %642 = vector.broadcast %cst_201 : f32 to vector<16x64xf32>
    %cst_202 = arith.constant dense<0.000000e+00> : vector<16x64xf32>
    %643 = tpu.matmul %629, %10, %cst_202 {dimension_numbers = #tpu.dot_dimension_numbers<[1], [0], [0], [1], [0, 0, 1, 1], [], []>} : vector<16x16xf32>, vector<16x64xf32>, vector<16x64xf32> -> vector<16x64xf32>
    %644 = arith.addf %642, %643 : vector<16x64xf32>
    %cst_203 = arith.constant dense<0.000000e+00> : vector<16x64xf32>
    %645 = tpu.matmul %633, %19, %cst_203 {dimension_numbers = #tpu.dot_dimension_numbers<[1], [0], [0], [1], [0, 0, 1, 1], [], []>} : vector<16x16xf32>, vector<16x64xf32>, vector<16x64xf32> -> vector<16x64xf32>
    %646 = arith.addf %644, %645 : vector<16x64xf32>
    %cst_204 = arith.constant dense<0.000000e+00> : vector<16x64xf32>
    %647 = tpu.matmul %637, %28, %cst_204 {dimension_numbers = #tpu.dot_dimension_numbers<[1], [0], [0], [1], [0, 0, 1, 1], [], []>} : vector<16x16xf32>, vector<16x64xf32>, vector<16x64xf32> -> vector<16x64xf32>
    %648 = arith.addf %646, %647 : vector<16x64xf32>
    %cst_205 = arith.constant dense<0.000000e+00> : vector<16x64xf32>
    %649 = tpu.matmul %641, %37, %cst_205 {dimension_numbers = #tpu.dot_dimension_numbers<[1], [0], [0], [1], [0, 0, 1, 1], [], []>} : vector<16x16xf32>, vector<16x64xf32>, vector<16x64xf32> -> vector<16x64xf32>
    %650 = arith.addf %648, %649 : vector<16x64xf32>
    %c0_206 = arith.constant 0 : index
    %c6_207 = arith.constant 6 : index
    %c0_208 = arith.constant 0 : index
    %c0_209 = arith.constant 0 : index
    %651 = vector.load %arg4[%c0_206, %c6_207, %c0_208, %c0_209] : memref<1x8x16x64xf32, #tpu.memory_space<vmem>>, vector<1x1x16x64xf32>
    %652 = vector.shape_cast %651 : vector<1x1x16x64xf32> to vector<16x64xf32>
    %653 = vector.shape_cast %650 : vector<16x64xf32> to vector<1x1x16x64xf32>
    tpu.vector_store %arg4[%c0_206, %c6_207, %c0_208, %c0_209], %653 {strides = array<i32>} : memref<1x8x16x64xf32, #tpu.memory_space<vmem>>, vector<1x1x16x64xf32>,
    %cst_210 = arith.constant 0.000000e+00 : f32
    %654 = vector.broadcast %cst_210 : f32 to vector<16x16xf32>
    %cst_211 = arith.constant 0.000000e+00 : f32
    %655 = vector.broadcast %cst_211 : f32 to vector<16x16xf32>
    %cst_212 = arith.constant 0.000000e+00 : f32
    %656 = vector.broadcast %cst_212 : f32 to vector<16x16xf32>
    %cst_213 = arith.constant 0.000000e+00 : f32
    %657 = vector.broadcast %cst_213 : f32 to vector<16x16xf32>
    %c0_214 = arith.constant 0 : index
    %c0_215 = arith.constant 0 : index
    %c0_216 = arith.constant 0 : index
    %c0_217 = arith.constant 0 : index
    %658 = vector.load %arg3[%c0_214, %c0_215, %c0_216, %c0_217] : memref<1x4x16x16xf32, #tpu.memory_space<vmem>>, vector<1x1x16x16xf32>
    %659 = vector.shape_cast %658 : vector<1x1x16x16xf32> to vector<16x16xf32>
    %c28 = arith.constant 28 : index
    %660 = memref.load %arg2[%c28] : memref<128xf32, #tpu.memory_space<smem>>
    %661 = vector.broadcast %660 : f32 to vector<16x16xf32>
    %662 = arith.mulf %659, %661 : vector<16x16xf32>
    %663 = arith.addf %654, %662 : vector<16x16xf32>
    %c29 = arith.constant 29 : index
    %664 = memref.load %arg2[%c29] : memref<128xf32, #tpu.memory_space<smem>>
    %665 = vector.broadcast %664 : f32 to vector<16x16xf32>
    %666 = arith.mulf %659, %665 : vector<16x16xf32>
    %667 = arith.addf %655, %666 : vector<16x16xf32>
    %c30 = arith.constant 30 : index
    %668 = memref.load %arg2[%c30] : memref<128xf32, #tpu.memory_space<smem>>
    %669 = vector.broadcast %668 : f32 to vector<16x16xf32>
    %670 = arith.mulf %659, %669 : vector<16x16xf32>
    %671 = arith.addf %656, %670 : vector<16x16xf32>
    %c31 = arith.constant 31 : index
    %672 = memref.load %arg2[%c31] : memref<128xf32, #tpu.memory_space<smem>>
    %673 = vector.broadcast %672 : f32 to vector<16x16xf32>
    %674 = arith.mulf %659, %673 : vector<16x16xf32>
    %675 = arith.addf %657, %674 : vector<16x16xf32>
    %c0_218 = arith.constant 0 : index
    %c1_219 = arith.constant 1 : index
    %c0_220 = arith.constant 0 : index
    %c0_221 = arith.constant 0 : index
    %676 = vector.load %arg3[%c0_218, %c1_219, %c0_220, %c0_221] : memref<1x4x16x16xf32, #tpu.memory_space<vmem>>, vector<1x1x16x16xf32>
    %677 = vector.shape_cast %676 : vector<1x1x16x16xf32> to vector<16x16xf32>
    %c60 = arith.constant 60 : index
    %678 = memref.load %arg2[%c60] : memref<128xf32, #tpu.memory_space<smem>>
    %679 = vector.broadcast %678 : f32 to vector<16x16xf32>
    %680 = arith.mulf %677, %679 : vector<16x16xf32>
    %681 = arith.addf %663, %680 : vector<16x16xf32>
    %c61 = arith.constant 61 : index
    %682 = memref.load %arg2[%c61] : memref<128xf32, #tpu.memory_space<smem>>
    %683 = vector.broadcast %682 : f32 to vector<16x16xf32>
    %684 = arith.mulf %677, %683 : vector<16x16xf32>
    %685 = arith.addf %667, %684 : vector<16x16xf32>
    %c62 = arith.constant 62 : index
    %686 = memref.load %arg2[%c62] : memref<128xf32, #tpu.memory_space<smem>>
    %687 = vector.broadcast %686 : f32 to vector<16x16xf32>
    %688 = arith.mulf %677, %687 : vector<16x16xf32>
    %689 = arith.addf %671, %688 : vector<16x16xf32>
    %c63 = arith.constant 63 : index
    %690 = memref.load %arg2[%c63] : memref<128xf32, #tpu.memory_space<smem>>
    %691 = vector.broadcast %690 : f32 to vector<16x16xf32>
    %692 = arith.mulf %677, %691 : vector<16x16xf32>
    %693 = arith.addf %675, %692 : vector<16x16xf32>
    %c0_222 = arith.constant 0 : index
    %c2_223 = arith.constant 2 : index
    %c0_224 = arith.constant 0 : index
    %c0_225 = arith.constant 0 : index
    %694 = vector.load %arg3[%c0_222, %c2_223, %c0_224, %c0_225] : memref<1x4x16x16xf32, #tpu.memory_space<vmem>>, vector<1x1x16x16xf32>
    %695 = vector.shape_cast %694 : vector<1x1x16x16xf32> to vector<16x16xf32>
    %c92 = arith.constant 92 : index
    %696 = memref.load %arg2[%c92] : memref<128xf32, #tpu.memory_space<smem>>
    %697 = vector.broadcast %696 : f32 to vector<16x16xf32>
    %698 = arith.mulf %695, %697 : vector<16x16xf32>
    %699 = arith.addf %681, %698 : vector<16x16xf32>
    %c93 = arith.constant 93 : index
    %700 = memref.load %arg2[%c93] : memref<128xf32, #tpu.memory_space<smem>>
    %701 = vector.broadcast %700 : f32 to vector<16x16xf32>
    %702 = arith.mulf %695, %701 : vector<16x16xf32>
    %703 = arith.addf %685, %702 : vector<16x16xf32>
    %c94 = arith.constant 94 : index
    %704 = memref.load %arg2[%c94] : memref<128xf32, #tpu.memory_space<smem>>
    %705 = vector.broadcast %704 : f32 to vector<16x16xf32>
    %706 = arith.mulf %695, %705 : vector<16x16xf32>
    %707 = arith.addf %689, %706 : vector<16x16xf32>
    %c95 = arith.constant 95 : index
    %708 = memref.load %arg2[%c95] : memref<128xf32, #tpu.memory_space<smem>>
    %709 = vector.broadcast %708 : f32 to vector<16x16xf32>
    %710 = arith.mulf %695, %709 : vector<16x16xf32>
    %711 = arith.addf %693, %710 : vector<16x16xf32>
    %c0_226 = arith.constant 0 : index
    %c3_227 = arith.constant 3 : index
    %c0_228 = arith.constant 0 : index
    %c0_229 = arith.constant 0 : index
    %712 = vector.load %arg3[%c0_226, %c3_227, %c0_228, %c0_229] : memref<1x4x16x16xf32, #tpu.memory_space<vmem>>, vector<1x1x16x16xf32>
    %713 = vector.shape_cast %712 : vector<1x1x16x16xf32> to vector<16x16xf32>
    %c124 = arith.constant 124 : index
    %714 = memref.load %arg2[%c124] : memref<128xf32, #tpu.memory_space<smem>>
    %715 = vector.broadcast %714 : f32 to vector<16x16xf32>
    %716 = arith.mulf %713, %715 : vector<16x16xf32>
    %717 = arith.addf %699, %716 : vector<16x16xf32>
    %c125 = arith.constant 125 : index
    %718 = memref.load %arg2[%c125] : memref<128xf32, #tpu.memory_space<smem>>
    %719 = vector.broadcast %718 : f32 to vector<16x16xf32>
    %720 = arith.mulf %713, %719 : vector<16x16xf32>
    %721 = arith.addf %703, %720 : vector<16x16xf32>
    %c126 = arith.constant 126 : index
    %722 = memref.load %arg2[%c126] : memref<128xf32, #tpu.memory_space<smem>>
    %723 = vector.broadcast %722 : f32 to vector<16x16xf32>
    %724 = arith.mulf %713, %723 : vector<16x16xf32>
    %725 = arith.addf %707, %724 : vector<16x16xf32>
    %c127 = arith.constant 127 : index
    %726 = memref.load %arg2[%c127] : memref<128xf32, #tpu.memory_space<smem>>
    %727 = vector.broadcast %726 : f32 to vector<16x16xf32>
    %728 = arith.mulf %713, %727 : vector<16x16xf32>
    %729 = arith.addf %711, %728 : vector<16x16xf32>
    %cst_230 = arith.constant 0.000000e+00 : f32
    %730 = vector.broadcast %cst_230 : f32 to vector<16x64xf32>
    %cst_231 = arith.constant dense<0.000000e+00> : vector<16x64xf32>
    %731 = tpu.matmul %717, %10, %cst_231 {dimension_numbers = #tpu.dot_dimension_numbers<[1], [0], [0], [1], [0, 0, 1, 1], [], []>} : vector<16x16xf32>, vector<16x64xf32>, vector<16x64xf32> -> vector<16x64xf32>
    %732 = arith.addf %730, %731 : vector<16x64xf32>
    %cst_232 = arith.constant dense<0.000000e+00> : vector<16x64xf32>
    %733 = tpu.matmul %721, %19, %cst_232 {dimension_numbers = #tpu.dot_dimension_numbers<[1], [0], [0], [1], [0, 0, 1, 1], [], []>} : vector<16x16xf32>, vector<16x64xf32>, vector<16x64xf32> -> vector<16x64xf32>
    %734 = arith.addf %732, %733 : vector<16x64xf32>
    %cst_233 = arith.constant dense<0.000000e+00> : vector<16x64xf32>
    %735 = tpu.matmul %725, %28, %cst_233 {dimension_numbers = #tpu.dot_dimension_numbers<[1], [0], [0], [1], [0, 0, 1, 1], [], []>} : vector<16x16xf32>, vector<16x64xf32>, vector<16x64xf32> -> vector<16x64xf32>
    %736 = arith.addf %734, %735 : vector<16x64xf32>
    %cst_234 = arith.constant dense<0.000000e+00> : vector<16x64xf32>
    %737 = tpu.matmul %729, %37, %cst_234 {dimension_numbers = #tpu.dot_dimension_numbers<[1], [0], [0], [1], [0, 0, 1, 1], [], []>} : vector<16x16xf32>, vector<16x64xf32>, vector<16x64xf32> -> vector<16x64xf32>
    %738 = arith.addf %736, %737 : vector<16x64xf32>
    %c0_235 = arith.constant 0 : index
    %c7_236 = arith.constant 7 : index
    %c0_237 = arith.constant 0 : index
    %c0_238 = arith.constant 0 : index
    %739 = vector.load %arg4[%c0_235, %c7_236, %c0_237, %c0_238] : memref<1x8x16x64xf32, #tpu.memory_space<vmem>>, vector<1x1x16x64xf32>
    %740 = vector.shape_cast %739 : vector<1x1x16x64xf32> to vector<16x64xf32>
    %741 = vector.shape_cast %738 : vector<16x64xf32> to vector<1x1x16x64xf32>
    tpu.vector_store %arg4[%c0_235, %c7_236, %c0_237, %c0_238], %741 {strides = array<i32>} : memref<1x8x16x64xf32, #tpu.memory_space<vmem>>, vector<1x1x16x64xf32>,
    return
  }
  func.func @transform_0(%arg0: i32, %arg1: i32) -> i32 {
    %c0_i32 = arith.constant 0 : i32
    %c0_i32_0 = arith.constant 0 : i32
    return %c0_i32 : i32
  }
  func.func @transform_1(%arg0: i32, %arg1: i32) -> (i32, i32, i32, i32) {
    %c0_i32 = arith.constant 0 : i32
    %c0_i32_0 = arith.constant 0 : i32
    %c0_i32_1 = arith.constant 0 : i32
    return %arg0, %c0_i32, %arg1, %c0_i32_0 : i32, i32, i32, i32
  }
  func.func @transform_2(%arg0: i32, %arg1: i32) -> (i32, i32, i32, i32) {
    %c0_i32 = arith.constant 0 : i32
    %c0_i32_0 = arith.constant 0 : i32
    %c0_i32_1 = arith.constant 0 : i32
    return %arg0, %c0_i32, %arg1, %c0_i32_0 : i32, i32, i32, i32
  }
}

</mosaic_0001>

<bundles_post_ra>
// kernel: tpu_custom_call.1
= control target key start
LH: loop header
LB: loop body
LE: loop exit
PB: predicated region body
PF: predicated region fallthrough
CT: control target
= control target key end

     0   :  { %7 = vsyncpa [#allocation5], 0  ;;  %s6191_s0 = inlined_call_operand.hbm [shape: f32[128], index: 0, kind: input, shape index: {}]   ;;  %s6192_s1 = inlined_call_operand.hbm [shape: f32[2,4,16,16], index: 1, kind: input, shape index: {}]   ;;  %s6193_s2 = inlined_call_operand.hbm [shape: f32[2,8,16,64], index: 2, kind: output, shape index: {}]  }
   0x1   :  { %8 = vsyncpa [#allocation3], 0 }
   0x2   :  { %10 = vsyncpa [#allocation3 + $0x1], 0 }
   0x3   :  { %11 = vsyncpa [#allocation4], 0 }
   0x4   :  { %13 = vsyncpa [#allocation4 + $0x1], 0  ;;  %s4942_s9 = smov 0   ;;  %s4944_s10 = smov 0  }
   0x5   :  { %s4946_s11 = smov 0   ;;  %s4948_s12 = smov 0  }
   0x6   :  { %s4950_s13 = smov 0   ;;  %s4952_s14 = smov 0  }
   0x7 LB: > { %s3830_s15 = sadd.s32 4294967295, %s4917_s14   ;;  %s3831_s16 = sadd.s32 4294967294, %s4917_s14   ;;  %s4917_s14 = sphi %s4952_s14, %s19_s14   ;;  %s4913_s13 = sphi %s4950_s13, %s6221_s13   ;;  %s4909_s12 = sphi %s4948_s12, %s6220_s12   ;;  %s4905_s11 = sphi %s4946_s11, %s6219_s11   ;;  %s4901_s10 = sphi %s4944_s10, %s6218_s10   ;;  %s4897_s9 = sphi %s4942_s9, %s6217_s9  }
   0x8   : > { %s61_s17 = sadd.s32 1, %s4905_s11  ;;  %p68_p0 = scmp.ne.s32.totalorder %s4905_s11, %s4901_s10 }
   0x9   : > { %p69_p1 = scmp.eq.s32.totalorder %s4917_s14, 0  ;;  %p74_p2 = scmp.ne.s32.totalorder %s4901_s10, %s4897_s9 }
   0xa   : > { %p4980_p3 = scmp.eq.s32.totalorder %s3830_s15, 0  ;;  %p100_p4 = scmp.eq.s32.totalorder %s3830_s15, 1 }
   0xb   : > { %p70_p5 = por %p69_p1, %p68_p0  ;;  %p106_p6 = scmp.eq.s32.totalorder %s3831_s16, 1 }
   0xc   : > { %s6198_s18 = scalar_select %p4980_p3, 1, 0 }
   0xd   : > { %p4986_p7 = por %p4980_p3, %p74_p2  ;;  %p4990_p8 = por %p100_p4, %p68_p0 }
   0xe   : > { %p4994_p9 = por %p106_p6, %p74_p2  ;;  %p3832_p10 = scmp.ge.s32.totalorder %s4917_s14, 1 }
   0xf   : > { %s6199_s19 = scalar_select %p4986_p7, 1, 0 }
  0x10   : > { %s6200_s20 = scalar_select %p4990_p8, 1, 0 }
  0x11   : > { %s6201_s21 = scalar_select %p4994_p9, 1, 0 }
  0x12   : > { %p113_p11 = scmp.lt.s32.totalorder %s4917_s14, 3  ;;  %p4723_p1 = scmp.lt.s32.totalorder %s4917_s14, 2 }
  0x13   : > { %s135_s23 = sand.u32 1, %s4905_s11   ;;  %s31_s25 = sadd.s32 1, %s4913_s13 }
  0x14   : > { %p5001_p13 = pnand %p3832_p10, %p113_p11  ;;  %p5009_p0 = pnand %p4723_p1, %p70_p5 }
  0x15   : > { %s3835_s26 = sshll.u32 %s135_s23, 6  ;;  %p33_p4 = scmp.ge.s32.totalorder %s31_s25, 2 }
  0x16   : > { %p4710_p7 = pneg %p5001_p13  ;;  %s4788_s29 = scalar_lea.hbm %s6191_s0, 16 }
  0x17   : > { %p4789_p6 = scmp.ne.s32.totalorder %s6191_s0, %s4788_s29  ;;  %p4795_p5 = scmp.lt.u32.totalorder %s4788_s29, %s6191_s0 }
  0x18   : > { %p4711_p2 = pnand %p4710_p7, %p4980_p3 }
  0x1a   : > { %p4790_p10 = pneg %p4711_p2 }
  0x1c   : > { %p4791_p11 = pnand %p4790_p10, %p4789_p6 }
  0x1e   : > { %p4792_p12 = pneg %p4791_p11 }
  0x20   : > { %p4797_p1 = pnand %p4795_p5, %p4792_p12 }
  0x22   : > { %4800 = shalt.err (!%p4797_p1)
}
  0x23   : > { %s4919_s6 = smov [#allocation2]   ;;  %s6223_s25 = smov (%p33_p4, %s31_s25), 0 }
  0x24   : > { %4713 = dma.hbm_to_smem (!%p4711_p2), %s6191_s0, 16, %s4919_s6, [#allocation5]  }
  0x25   : > { %s4172_s15 = sshll.u32 %s4913_s13, 10  ;;  %s56_s16 = ssub.s32 %s4913_s13, %s6223_s25 }
  0x26   : > { %s5036_s29 = scalar_lea.hbm %s6192_s1, %s4172_s15  ;;  %p59_p7 = scmp.eq.s32.totalorder %s56_s16, 0 }
  0x27   : > { %s139_s30 = scalar_lea.vmem [#allocation6], %s3835_s26  ;;  %s5045_s5 = scalar_lea.sflag [#allocation3], %s135_s23 }
  0x28   : > { %s148_s3 = sshll.u32 %s139_s30, 4  ;;  %s4801_s6 = scalar_lea.hbm %s5036_s29, 1024  ;;  %s5038_s3 = int_to_ptr.vmem [resolvable:$true] %s148_s3 }
  0x29   : > { %s5043_s4 = scalar_select %p59_p7, %s4905_s11, %s61_s17  }
  0x2a   : > { %p4802_p12 = scmp.ne.s32.totalorder %s5036_s29, %s4801_s6  ;;  %p4803_p2 = pneg %p5009_p0 }
  0x2b   : > { %s4806_s26 = scalar_lea.hbm %s6192_s1, 2048  ;;  %p4807_p10 = scmp.lt.u32.totalorder %s5036_s29, %s6192_s1 }
  0x2c   : > { %p4804_p4 = pnand %p4803_p2, %p4802_p12  ;;  %p4808_p11 = scmp.lt.u32.totalorder %s4806_s26, %s4801_s6 }
  0x2d   : > { %p4810_p1 = scmp.lt.u32.totalorder %s4801_s6, %s5036_s29 }
  0x2e   : > { %p4805_p6 = pneg %p4804_p4  ;;  %p4809_p5 = por %p4808_p11, %p4807_p10 }
  0x30   : > { %p4811_p7 = por %p4810_p1, %p4809_p5 }
  0x32   : > { %p4812_p9 = pnand %p4811_p7, %p4805_p6 }
  0x34   : > { %4815 = shalt.err (!%p4812_p9)
}
  0x35   : > { %s4816_s17 = scalar_lea.vmem %s5038_s3, 1024  ;;  %s4920_s23 = smov [#allocation6]  }
  0x36   : > { %p4817_p12 = scmp.ne.s32.totalorder %s5038_s3, %s4816_s17  ;;  %s4821_s27 = sshll.u32 %s4920_s23, 4  ;;  %s4822_s27 = int_to_ptr.vmem [resolvable:$false] %s4821_s27 }
  0x37   : > { %s4823_s28 = scalar_lea.vmem %s4822_s27, 2048  ;;  %p4824_p3 = scmp.lt.s32.totalorder %s5038_s3, %s4822_s27 }
  0x38   : > { %p4819_p4 = pnand %p4817_p12, %p4803_p2  ;;  %p4825_p10 = scmp.lt.s32.totalorder %s4823_s28, %s4816_s17 }
  0x3a   : > { %p4820_p8 = pneg %p4819_p4  ;;  %p4826_p11 = por %p4825_p10, %p4824_p3 }
  0x3c   : > { %p4827_p5 = pnand %p4826_p11, %p4820_p8 }
  0x3e   : > { %4830 = shalt.err (!%p4827_p5)
}
  0x3f   : > { %s4921_s30 = smov 128   ;;  %s4922_s6 = smov 8  }
  0x40   : > { %4717 = dma.hbm_to_vmem [thread:$0]  (!%p5009_p0), %s5036_s29, 1024, %s5038_s3, %s5045_s5, %s4921_s30, %s4921_s30, %s4922_s6  }
  0x41   : > { %160 = sbr.rel (%p5001_p13) target bundleno = 465 (0x1d1), region = 28  ;;  %p6204_p9 = scmp.ne.s32.totalorder (!%p5001_p13), %s6198_s18, 0 }
  0x48   : > { %4884 = dma.done.wait (%p6204_p9), [#allocation5], 16  }
  0x49   : > { %4886 = vsyncadd (%p6204_p9), [#allocation5], 4294967280  ;;  %s5080_s7 = sand.u32 1, %s4901_s10   ;;  %p6205_p3 = scmp.ne.s32.totalorder %s6199_s19, 0 }
  0x4a   : > { %s3840_s8 = sshll.u32 %s5080_s7, 6  ;;  %s167_s26 = scalar_lea.sflag [#allocation3], %s5080_s7 }
  0x4b   : > { %s5084_s15 = scalar_lea.vmem [#allocation6], %s3840_s8 }
  0x4c   : > { %4888 = dma.done.wait (%p6205_p3), %s167_s26, 1024  }
  0x4d   : > { %4890 = vsyncadd (%p6205_p3), %s167_s26, 4294966272 }
  0x4e   : > { %175 = sfence }
  0x4f   : > { %v194_v0 = vlaneseq  ;;  %s3850_s18 = sld [smem:[#allocation2 + $0x1]]  ;;  %v5093_v2 = vld [vmem:[%s5084_s15] sm:$0xff]  ;;  %v5096_v3 = vld [vmem:[%s5084_s15 + $0x8] sm:$0xff]  ;;  %v5103_v5 = vld [vmem:[%s5084_s15 + $0x10] sm:$0xff]  ;;  %s5107_s29 = sld [smem:[#allocation2 + $0x5]]  ;;  %vm338_vm0 = vcmask 130048  }
  0x50   : > { %s5090_s22 = sld [smem:[#allocation2 + $0x21]]  ;;  %s5109_s3 = sld [smem:[#allocation2 + $0x25]]  ;;  %v5114_v8 = vld [vmem:[%s5084_s15 + $0x18] sm:$0xff]  ;;  %v5127_v15 = vld [vmem:[%s5084_s15 + $0x20] sm:$0xff]  ;;  %v5130_v16 = vld [vmem:[%s5084_s15 + $0x28] sm:$0xff]  ;;  %vm667_vm13 = vcmask 523264  }
  0x51   : > { %v195_v1 = vshrl.u32 %v194_v0, 7  ;;  %s5098_s24 = sld [smem:[#allocation2 + $0x41]]  ;;  %v5100_v4 = vand.u32 127, %v194_v0  ;;  %s5111_s5 = sld [smem:[#allocation2 + $0x45]]  ;;  %v5133_v17 = vld [vmem:[%s5084_s15 + $0x30] sm:$0xff]  ;;  %v5144_v22 = vld [vmem:[%s5084_s15 + $0x38] sm:$0xff] }
  0x52   : > { %s5105_s19 = sld [smem:[#allocation2 + $0x61]]  ;;  %s5116_s16 = sld [smem:[#allocation2 + $0x65]]  ;;  %v4923_v35 = vmov 1.0|1.0  }
  0x53   : > { %v196_v6 = vadd.s32 8, %v195_v1  ;;  %v199_v7 = vmul.u32 2, %v195_v1  ;;  %s5118_s17 = sld [smem:[#allocation2]]  ;;  %s5174_s30 = sld [smem:[#allocation2 + $0x4]] }
  0x54   : > { %s5135_s23 = sld [smem:[#allocation2 + $0x20]]  ;;  %s5185_s6 = sld [smem:[#allocation2 + $0x24]] }
  0x55   : > { %v5120_v9 = vmul.u32 2, %v196_v6  ;;  %v207_v10 = vadd.s32 1, %v199_v7  ;;  %v240_v11 = vstv %s3850_s18  ;;  %vm201_vm1 = vcmp.eq.s32.totalorder %v5100_v4, %v199_v7  ;;  %s5146_s27 = sld [smem:[#allocation2 + $0x40]]  ;;  %s5187_s8 = sld [smem:[#allocation2 + $0x44]] }
  0x56   : > { %v241_v12 = vmul.f32 %v240_v11, %v5093_v2  ;;  %v242_v13 = vmul.f32 %v240_v11, %v5096_v3  ;;  %v267_v14 = vstv %s5090_s22  ;;  %v5137_v18 = vadd.s32 32, %v199_v7  ;;  %s5148_s28 = sld [smem:[#allocation2 + $0x60]]  ;;  %s5199_s26 = sld [smem:[#allocation2 + $0x64]] }
  0x57   : > { %v208_v19 = vadd.s32 1, %v5120_v9  ;;  %vm209_vm2 = vcmp.eq.s32.totalorder %v5100_v4, %v207_v10  ;;  %v268_v20 = vmul.f32 %v5103_v5, %v267_v14  ;;  %v269_v21 = vmul.f32 %v5114_v8, %v267_v14  ;;  %s5216_s18 = sld [smem:[#allocation2 + $0x2]]  ;;  %p6214_p13 = scmp.ne.s32.totalorder %s6200_s20, 0 }
  0x58   : > { %v294_v23 = vstv %s5098_s24  ;;  %v321_v24 = vstv %s5105_s19  ;;  %v679_v25 = vstv %s5107_s29  ;;  %vm202_vm3 = vcmp.eq.s32.totalorder %v5100_v4, %v5120_v9  ;;  %s5219_s22 = sld [smem:[#allocation2 + $0x22]]  ;;  %s5238_s29 = sld [smem:[#allocation2 + $0x6]] }
  0x59   : > { %vm210_vm4 = vcmp.eq.s32.totalorder %v5100_v4, %v208_v19  ;;  %v270_v26 = vadd.f32 %v268_v20, %v241_v12  ;;  %v295_v27 = vmul.f32 %v5127_v15, %v294_v23  ;;  %v296_v28 = vmul.f32 %v5130_v16, %v294_v23  ;;  %vm5160_vm5 = vmpackc.low %vm202_vm3, %vm201_vm1  ;;  %s5221_s24 = sld [smem:[#allocation2 + $0x42]] }
  0x5a   : > { %vm5166_vm6 = vmpackc.low %vm210_vm4, %vm209_vm2  ;;  %v322_v31 = vmul.f32 %v5133_v17, %v321_v24  ;;  %v323_v32 = vmul.f32 %v5144_v22, %v321_v24  ;;  %v680_v33 = vmul.f32 %v679_v25, %v5093_v2  ;;  %v681_v34 = vmul.f32 %v679_v25, %v5096_v3  ;;  %s5227_s19 = sld [smem:[#allocation2 + $0x62]] }
  0x5b   : > { %4527 = vmatprep.subr.msk.bf16.mxu0 %vm5166_vm6, %v4923_v35  ;;  %4543 = vmatprep.subr.msk.bf16.mxu1 %vm5166_vm6, %v4923_v35  ;;  %v297_v36 = vadd.f32 %v295_v27, %v270_v26  ;;  %v705_v37 = vstv %s5109_s3  ;;  %v731_v38 = vstv %s5111_s5  ;;  %v757_v39 = vstv %s5116_s16  ;;  %s5240_s3 = sld [smem:[#allocation2 + $0x26]] }
  0x5c   : > { %4529 = vmatpush3.bf16.msk.msra.mxu0 %vm5166_vm6, %v4923_v35  ;;  %4545 = vmatpush3.bf16.msk.msra.mxu1 %vm5166_vm6, %v4923_v35  ;;  %v706_v40 = vmul.f32 %v5103_v5, %v705_v37  ;;  %v707_v41 = vmul.f32 %v5114_v8, %v705_v37  ;;  %v732_v42 = vmul.f32 %v5127_v15, %v731_v38  ;;  %v234_v43 = vstv %s5118_s17  ;;  %s5252_s5 = sld [smem:[#allocation2 + $0x46]]  ;;  %s5282_s17 = sld [smem:[#allocation2 + $0x3]] }
  0x5d   : > { %v324_v44 = vadd.f32 %v322_v31, %v297_v36  ;;  %v733_v45 = vmul.f32 %v5130_v16, %v731_v38  ;;  %v758_v46 = vmul.f32 %v5133_v17, %v757_v39  ;;  %v759_v47 = vmul.f32 %v5144_v22, %v757_v39  ;;  %4531 = vmatprep.subr.msk.bf16.mxu0 %vm5160_vm5, %v4923_v35  ;;  %s5254_s16 = sld [smem:[#allocation2 + $0x66]] }
  0x5e   : > { %v708_v48 = vadd.f32 %v706_v40, %v680_v33  ;;  %v271_v49 = vadd.f32 %v269_v21, %v242_v13  ;;  %v709_v50 = vadd.f32 %v707_v41, %v681_v34  ;;  %4547 = vmatprep.subr.msk.bf16.mxu1 %vm5160_vm5, %v4923_v35  ;;  %v235_v51 = vmul.f32 %v234_v43, %v5093_v2 }
  0x5f   : > { %4306 = vmatprep.mubr.msk.f32.mxu0 %vm338_vm0, %v324_v44  ;;  %v236_v52 = vmul.f32 %v234_v43, %v5096_v3  ;;  %v261_v53 = vstv %s5135_s23  ;;  %v288_v54 = vstv %s5146_s27  ;;  %v315_v55 = vstv %s5148_s28  ;;  %s5287_s23 = sld [smem:[#allocation2 + $0x23]] }
  0x60   : > { %v734_v56 = vadd.f32 %v732_v42, %v708_v48  ;;  %v298_v57 = vadd.f32 %v296_v28, %v271_v49  ;;  %v735_v58 = vadd.f32 %v733_v45, %v709_v50  ;;  %v262_v59 = vmul.f32 %v5103_v5, %v261_v53  ;;  %s5289_s27 = sld [smem:[#allocation2 + $0x43]] }
  0x61   : > { %v263_v60 = vmul.f32 %v5114_v8, %v261_v53  ;;  %v289_v61 = vmul.f32 %v5127_v15, %v288_v54  ;;  %v290_v62 = vmul.f32 %v5130_v16, %v288_v54  ;;  %v316_v63 = vmul.f32 %v5133_v17, %v315_v55  ;;  %s5301_s28 = sld [smem:[#allocation2 + $0x63]] }
  0x62   : > { %v760_v0 = vadd.f32 %v758_v46, %v734_v56  ;;  %v325_v1 = vadd.f32 %v323_v32, %v298_v57  ;;  %v761_v6 = vadd.f32 %v759_v47, %v735_v58  ;;  %v264_v7 = vadd.f32 %v262_v59, %v235_v51 }
  0x63   : > { %v317_v10 = vmul.f32 %v5144_v22, %v315_v55  ;;  %v673_v11 = vstv %s5174_s30  ;;  %v699_v12 = vstv %s5185_s6  ;;  %v725_v13 = vstv %s5187_s8  ;;  %s5310_s30 = sld [smem:[#allocation2 + $0x7]] }
  0x64   : > { %4334 = vmatprep.mubr.msk.f32.mxu1 %vm338_vm0, %v760_v0  ;;  %4307 = vmatmul.mubr.msk.f32.vlgmr.msra.gmra.mrb[0].mxu0 %vm338_vm0, %v325_v1  ;;  %v291_v14 = vadd.f32 %v289_v61, %v264_v7  ;;  %v674_v19 = vmul.f32 %v673_v11, %v5093_v2  ;;  %v675_v20 = vmul.f32 %v673_v11, %v5096_v3  ;;  %v751_v21 = vstv %s5199_s26  ;;  %s5312_s6 = sld [smem:[#allocation2 + $0x27]] }
  0x65   : > { %4335 = vmatmul.mubr.msk.f32.vlgmr.msra.gmra.mrb[0].mxu1 %vm338_vm0, %v761_v6  ;;  %4533 = vmatpush3.bf16.msk.msra.mxu0 %vm5160_vm5, %v4923_v35  ;;  %v700_v23 = vmul.f32 %v5103_v5, %v699_v12  ;;  %v701_v24 = vmul.f32 %v5114_v8, %v699_v12  ;;  %v726_v25 = vmul.f32 %v5127_v15, %v725_v13  ;;  %v5250_v26 = vadd.s32 32, %v5120_v9  ;;  %s5321_s8 = sld [smem:[#allocation2 + $0x47]] }
  0x66   : > { %4549 = vmatpush3.bf16.msk.msra.mxu1 %vm5160_vm5, %v4923_v35  ;;  %v318_v27 = vadd.f32 %v316_v63, %v291_v14  ;;  %v727_v28 = vmul.f32 %v5130_v16, %v725_v13  ;;  %v752_v31 = vmul.f32 %v5133_v17, %v751_v21  ;;  %v753_v32 = vmul.f32 %v5144_v22, %v751_v21  ;;  %s5323_s26 = sld [smem:[#allocation2 + $0x67]] }
  0x67   : > { %v702_v9 = vadd.f32 %v700_v23, %v674_v19  ;;  %v265_v33 = vadd.f32 %v263_v60, %v236_v52  ;;  %vm217_vm7 = vcmp.eq.s32.totalorder %v5100_v4, %v5137_v18  ;;  %vm218_vm8 = vcmp.eq.s32.totalorder %v5100_v4, %v5250_v26 }
  0x68   : > { %4313 = vmatprep.mubr.msk.f32.mxu0 %vm338_vm0, %v318_v27  ;;  %vm5267_vm9 = vmpackc.low %vm218_vm8, %vm217_vm7  ;;  %v703_v36 = vadd.f32 %v701_v24, %v675_v20  ;;  %v246_v37 = vstv %s5216_s18  ;;  %v273_v38 = vstv %s5219_s22  ;;  %v300_v39 = vstv %s5221_s24  ;;  %s5333_s18 = sld [smem:[#allocation2 + $0x9]] }
  0x69   : > { %v728_v40 = vadd.f32 %v726_v25, %v702_v9  ;;  %v292_v41 = vadd.f32 %v290_v62, %v265_v33  ;;  %4535 = vmatprep.subr.msk.bf16.mxu0 %vm5267_vm9, %v4923_v35  ;;  %4551 = vmatprep.subr.msk.bf16.mxu1 %vm5267_vm9, %v4923_v35  ;;  %v247_v42 = vmul.f32 %v246_v37, %v5093_v2  ;;  %v327_v43 = vstv %s5227_s19  ;;  %s5337_s22 = sld [smem:[#allocation2 + $0x29]] }
  0x6a   : > { %v729_v44 = vadd.f32 %v727_v28, %v703_v36  ;;  %v248_v45 = vmul.f32 %v246_v37, %v5096_v3  ;;  %v274_v46 = vmul.f32 %v5103_v5, %v273_v38  ;;  %v275_v47 = vmul.f32 %v5114_v8, %v273_v38  ;;  %s5339_s24 = sld [smem:[#allocation2 + $0x49]] }
  0x6b   : > { %v754_v48 = vadd.f32 %v752_v31, %v728_v40  ;;  %v319_v49 = vadd.f32 %v317_v10, %v292_v41  ;;  %v301_v50 = vmul.f32 %v5127_v15, %v300_v39  ;;  %v302_v51 = vmul.f32 %v5130_v16, %v300_v39  ;;  %s5362_s19 = sld [smem:[#allocation2 + $0x69]] }
  0x6c   : > { %v755_v52 = vadd.f32 %v753_v32, %v729_v44  ;;  %v276_v53 = vadd.f32 %v274_v46, %v247_v42  ;;  %v328_v54 = vmul.f32 %v5133_v17, %v327_v43  ;;  %v329_v55 = vmul.f32 %v5144_v22, %v327_v43 }
  0x6d   : > { %4341 = vmatprep.mubr.msk.f32.mxu1 %vm338_vm0, %v754_v48  ;;  %4314 = vmatmul.mubr.msk.f32.vlgmr.msra.gmra.mrb[0].mxu0 %vm338_vm0, %v319_v49  ;;  %v685_v56 = vstv %s5238_s29  ;;  %v711_v57 = vstv %s5240_s3  ;;  %v737_v58 = vstv %s5252_s5  ;;  %v763_v59 = vstv %s5254_s16  ;;  %s5372_s29 = sld [smem:[#allocation2 + $0xd]] }
  0x6e   : > { %4342 = vmatmul.mubr.msk.f32.vlgmr.msra.gmra.mrb[0].mxu1 %vm338_vm0, %v755_v52  ;;  %4537 = vmatpush3.bf16.msk.msra.mxu0 %vm5267_vm9, %v4923_v35  ;;  %v303_v60 = vadd.f32 %v301_v50, %v276_v53  ;;  %v686_v61 = vmul.f32 %v685_v56, %v5093_v2  ;;  %v687_v62 = vmul.f32 %v685_v56, %v5096_v3  ;;  %v223_v63 = vadd.s32 1, %v5137_v18  ;;  %s5374_s3 = sld [smem:[#allocation2 + $0x2d]] }
  0x6f   : > { %4553 = vmatpush3.bf16.msk.msra.mxu1 %vm5267_vm9, %v4923_v35  ;;  %v712_v0 = vmul.f32 %v5103_v5, %v711_v57  ;;  %v713_v1 = vmul.f32 %v5114_v8, %v711_v57  ;;  %v738_v6 = vmul.f32 %v5127_v15, %v737_v58  ;;  %v739_v7 = vmul.f32 %v5130_v16, %v737_v58  ;;  %s5380_s5 = sld [smem:[#allocation2 + $0x4d]] }
  0x70   : > { %v330_v18 = vadd.f32 %v328_v54, %v303_v60  ;;  %v764_v10 = vmul.f32 %v5133_v17, %v763_v59  ;;  %v765_v11 = vmul.f32 %v5144_v22, %v763_v59  ;;  %v277_v12 = vadd.f32 %v275_v47, %v248_v45  ;;  %s5382_s16 = sld [smem:[#allocation2 + $0x6d]] }
  0x71   : > { %v714_v13 = vadd.f32 %v712_v0, %v686_v61  ;;  %v224_v14 = vadd.s32 1, %v5250_v26  ;;  %vm225_vm10 = vcmp.eq.s32.totalorder %v5100_v4, %v223_v63  ;;  %v715_v19 = vadd.f32 %v713_v1, %v687_v62 }
  0x72   : > { %4320 = vmatprep.mubr.msk.f32.mxu0 %vm338_vm0, %v330_v18  ;;  %v304_v20 = vadd.f32 %v302_v51, %v277_v12  ;;  %v252_v21 = vstv %s5282_s17  ;;  %v279_v23 = vstv %s5287_s23  ;;  %v306_v24 = vstv %s5289_s27  ;;  %s5391_s17 = sld [smem:[#allocation2 + $0x8]] }
  0x73   : > { %v740_v25 = vadd.f32 %v738_v6, %v714_v13  ;;  %vm226_vm11 = vcmp.eq.s32.totalorder %v5100_v4, %v224_v14  ;;  %v741_v27 = vadd.f32 %v739_v7, %v715_v19  ;;  %v253_v28 = vmul.f32 %v252_v21, %v5093_v2  ;;  %s5406_s23 = sld [smem:[#allocation2 + $0x28]] }
  0x74   : > { %v331_v26 = vadd.f32 %v329_v55, %v304_v20  ;;  %vm5343_vm12 = vmpackc.low %vm226_vm11, %vm225_vm10  ;;  %v254_v32 = vmul.f32 %v252_v21, %v5096_v3  ;;  %v280_v9 = vmul.f32 %v5103_v5, %v279_v23  ;;  %v281_v33 = vmul.f32 %v5114_v8, %v279_v23  ;;  %s5411_s27 = sld [smem:[#allocation2 + $0x48]] }
  0x75   : > { %v766_v36 = vadd.f32 %v764_v10, %v740_v25  ;;  %4539 = vmatprep.subr.msk.bf16.mxu0 %vm5343_vm12, %v4923_v35  ;;  %v767_v4 = vadd.f32 %v765_v11, %v741_v27  ;;  %4555 = vmatprep.subr.msk.bf16.mxu1 %vm5343_vm12, %v4923_v35  ;;  %v307_v37 = vmul.f32 %v5127_v15, %v306_v24  ;;  %v333_v38 = vstv %s5301_s28  ;;  %s5413_s28 = sld [smem:[#allocation2 + $0x68]] }
  0x76   : > { %4321 = vmatmul.mubr.msk.f32.vlgmr.msra.gmra.mrb[0].mxu0 %vm338_vm0, %v331_v26  ;;  %v282_v39 = vadd.f32 %v280_v9, %v253_v28  ;;  %v308_v40 = vmul.f32 %v5130_v16, %v306_v24  ;;  %v334_v41 = vmul.f32 %v5133_v17, %v333_v38  ;;  %v335_v42 = vmul.f32 %v5144_v22, %v333_v38 }
  0x77   : > { %4348 = vmatprep.mubr.msk.f32.mxu1 %vm338_vm0, %v766_v36  ;;  %4541 = vmatpush3.bf16.msk.msra.mxu0 %vm5343_vm12, %v4923_v35  ;;  %v691_v43 = vstv %s5310_s30  ;;  %v717_v44 = vstv %s5312_s6  ;;  %v743_v45 = vstv %s5321_s8  ;;  %v769_v46 = vstv %s5323_s26  ;;  %s5425_s30 = sld [smem:[#allocation2 + $0xc]] }
  0x78   : > { %4349 = vmatmul.mubr.msk.f32.vlgmr.msra.gmra.mrb[0].mxu1 %vm338_vm0, %v767_v4  ;;  %v309_v47 = vadd.f32 %v307_v37, %v282_v39  ;;  %v692_v48 = vmul.f32 %v691_v43, %v5093_v2  ;;  %v693_v49 = vmul.f32 %v691_v43, %v5096_v3  ;;  %v718_v50 = vmul.f32 %v5103_v5, %v717_v44  ;;  %s5427_s6 = sld [smem:[#allocation2 + $0x2c]] }
  0x79   : > { %4557 = vmatpush3.bf16.msk.msra.mxu1 %vm5343_vm12, %v4923_v35  ;;  %v719_v51 = vmul.f32 %v5114_v8, %v717_v44  ;;  %v744_v52 = vmul.f32 %v5127_v15, %v743_v45  ;;  %v745_v53 = vmul.f32 %v5130_v16, %v743_v45  ;;  %v770_v54 = vmul.f32 %v5133_v17, %v769_v46  ;;  %s5436_s8 = sld [smem:[#allocation2 + $0x4c]] }
  0x7a   : > { %v336_v55 = vadd.f32 %v334_v41, %v309_v47  ;;  %v720_v56 = vadd.f32 %v718_v50, %v692_v48  ;;  %v771_v57 = vmul.f32 %v5144_v22, %v769_v46  ;;  %v283_v58 = vadd.f32 %v281_v33, %v254_v32  ;;  %4559 = vmatprep.subr.msk.bf16.mxu0 %vm5166_vm6, %v4923_v35  ;;  %s5438_s26 = sld [smem:[#allocation2 + $0x6c]] }
  0x7b   : > { %v721_v59 = vadd.f32 %v719_v51, %v693_v49  ;;  %4575 = vmatprep.subr.msk.bf16.mxu1 %vm5166_vm6, %v4923_v35  ;;  %v1114_v60 = vstv %s5333_s18  ;;  %v1140_v61 = vstv %s5337_s22  ;;  %v1166_v62 = vstv %s5339_s24  ;;  %s5447_s18 = sld [smem:[#allocation2 + $0xa]] }
  0x7c   : > { %4327 = vmatprep.mubr.msk.f32.mxu0 %vm338_vm0, %v336_v55  ;;  %v746_v63 = vadd.f32 %v744_v52, %v720_v56  ;;  %v310_v0 = vadd.f32 %v308_v40, %v283_v58  ;;  %v1115_v1 = vmul.f32 %v1114_v60, %v5093_v2  ;;  %v1116_v6 = vmul.f32 %v1114_v60, %v5096_v3  ;;  %s5463_s22 = sld [smem:[#allocation2 + $0x2a]] }
  0x7d   : > { %v747_v7 = vadd.f32 %v745_v53, %v721_v59  ;;  %v1141_v18 = vmul.f32 %v5103_v5, %v1140_v61  ;;  %v1142_v10 = vmul.f32 %v5114_v8, %v1140_v61  ;;  %v1167_v11 = vmul.f32 %v5127_v15, %v1166_v62  ;;  %s5470_s24 = sld [smem:[#allocation2 + $0x4a]] }
  0x7e   : > { %v772_v12 = vadd.f32 %v770_v54, %v746_v63  ;;  %v337_v13 = vadd.f32 %v335_v42, %v310_v0  ;;  %v1168_v14 = vmul.f32 %v5130_v16, %v1166_v62  ;;  %v1192_v19 = vstv %s5362_s19  ;;  %s5472_s19 = sld [smem:[#allocation2 + $0x6a]] }
  0x7f   : > { %v773_v20 = vadd.f32 %v771_v57, %v747_v7  ;;  %v1143_v21 = vadd.f32 %v1141_v18, %v1115_v1  ;;  %v1193_v23 = vmul.f32 %v5133_v17, %v1192_v19  ;;  %v1194_v24 = vmul.f32 %v5144_v22, %v1192_v19 }
  0x80   : > { %4355 = vmatprep.mubr.msk.f32.mxu1 %vm338_vm0, %v772_v12  ;;  %4328 = vmatmul.mubr.msk.f32.vlgmr.msra.gmra.mrb[0].mxu0 %vm338_vm0, %v337_v13  ;;  %v1549_v25 = vstv %s5372_s29  ;;  %v1575_v27 = vstv %s5374_s3  ;;  %v1601_v28 = vstv %s5380_s5  ;;  %v1627_v26 = vstv %s5382_s16  ;;  %s5480_s29 = sld [smem:[#allocation2 + $0xe]] }
  0x81   : > { %4356 = vmatmul.mubr.msk.f32.vlgmr.msra.gmra.mrb[0].mxu1 %vm338_vm0, %v773_v20  ;;  %4561 = vmatpush3.bf16.msk.msra.mxu0 %vm5166_vm6, %v4923_v35  ;;  %v1169_v32 = vadd.f32 %v1167_v11, %v1143_v21  ;;  %v1550_v9 = vmul.f32 %v1549_v25, %v5093_v2  ;;  %v1551_v33 = vmul.f32 %v1549_v25, %v5096_v3  ;;  %v1108_v36 = vstv %s5391_s17  ;;  %s5489_s3 = sld [smem:[#allocation2 + $0x2e]]  ;;  %s5513_s17 = sld [smem:[#allocation2 + $0xb]] }
  0x82   : > { %4577 = vmatpush3.bf16.msk.msra.mxu1 %vm5166_vm6, %v4923_v35  ;;  %v1576_v4 = vmul.f32 %v5103_v5, %v1575_v27  ;;  %v1577_v37 = vmul.f32 %v5114_v8, %v1575_v27  ;;  %v1602_v38 = vmul.f32 %v5127_v15, %v1601_v28  ;;  %v1603_v39 = vmul.f32 %v5130_v16, %v1601_v28  ;;  %s5491_s5 = sld [smem:[#allocation2 + $0x4e]] }
  0x83   : > { %v1195_v40 = vadd.f32 %v1193_v23, %v1169_v32  ;;  %v1628_v41 = vmul.f32 %v5133_v17, %v1627_v26  ;;  %v1629_v42 = vmul.f32 %v5144_v22, %v1627_v26  ;;  %v1144_v43 = vadd.f32 %v1142_v10, %v1116_v6  ;;  %4563 = vmatprep.subr.msk.bf16.mxu0 %vm5160_vm5, %v4923_v35  ;;  %s5498_s16 = sld [smem:[#allocation2 + $0x6e]] }
  0x84   : > { %v1578_v44 = vadd.f32 %v1576_v4, %v1550_v9  ;;  %v1579_v45 = vadd.f32 %v1577_v37, %v1551_v33  ;;  %4579 = vmatprep.subr.msk.bf16.mxu1 %vm5160_vm5, %v4923_v35  ;;  %v1109_v46 = vmul.f32 %v1108_v36, %v5093_v2  ;;  %v1110_v47 = vmul.f32 %v1108_v36, %v5096_v3 }
  0x85   : > { %4362 = vmatprep.mubr.msk.f32.mxu0 %vm338_vm0, %v1195_v40  ;;  %v1170_v48 = vadd.f32 %v1168_v14, %v1144_v43  ;;  %v1134_v49 = vstv %s5406_s23  ;;  %v1160_v50 = vstv %s5411_s27  ;;  %v1186_v51 = vstv %s5413_s28  ;;  %s5519_s23 = sld [smem:[#allocation2 + $0x2b]] }
  0x86   : > { %v1604_v52 = vadd.f32 %v1602_v38, %v1578_v44  ;;  %v1605_v53 = vadd.f32 %v1603_v39, %v1579_v45  ;;  %v1135_v54 = vmul.f32 %v5103_v5, %v1134_v49  ;;  %v1136_v55 = vmul.f32 %v5114_v8, %v1134_v49  ;;  %s5521_s27 = sld [smem:[#allocation2 + $0x4b]] }
  0x87   : > { %v1196_v56 = vadd.f32 %v1194_v24, %v1170_v48  ;;  %v1161_v57 = vmul.f32 %v5127_v15, %v1160_v50  ;;  %v1162_v58 = vmul.f32 %v5130_v16, %v1160_v50  ;;  %v1187_v59 = vmul.f32 %v5133_v17, %v1186_v51  ;;  %s5529_s28 = sld [smem:[#allocation2 + $0x6b]] }
  0x88   : > { %v1630_v60 = vadd.f32 %v1628_v41, %v1604_v52  ;;  %v1631_v61 = vadd.f32 %v1629_v42, %v1605_v53  ;;  %v1137_v62 = vadd.f32 %v1135_v54, %v1109_v46  ;;  %v1188_v63 = vmul.f32 %v5144_v22, %v1186_v51 }
  0x89   : > { %4363 = vmatmul.mubr.msk.f32.vlgmr.msra.gmra.mrb[2].mxu0 %vm338_vm0, %v1196_v56  ;;  %v1543_v0 = vstv %s5425_s30  ;;  %v1569_v1 = vstv %s5427_s6  ;;  %v1595_v6 = vstv %s5436_s8  ;;  %v1621_v7 = vstv %s5438_s26  ;;  %s5535_s30 = sld [smem:[#allocation2 + $0xf]] }
  0x8a   : > { %4390 = vmatprep.mubr.msk.f32.mxu1 %vm338_vm0, %v1630_v60  ;;  %4565 = vmatpush3.bf16.msk.msra.mxu0 %vm5160_vm5, %v4923_v35  ;;  %v1163_v18 = vadd.f32 %v1161_v57, %v1137_v62  ;;  %v1544_v10 = vmul.f32 %v1543_v0, %v5093_v2  ;;  %v1545_v11 = vmul.f32 %v1543_v0, %v5096_v3  ;;  %v1120_v12 = vstv %s5447_s18  ;;  %s5537_s6 = sld [smem:[#allocation2 + $0x2f]]  ;;  %s5555_s18 = sld [smem:[#allocation2 + $0x11]] }
  0x8b   : > { %4391 = vmatmul.mubr.msk.f32.vlgmr.msra.gmra.mrb[2].mxu1 %vm338_vm0, %v1631_v61  ;;  %v1570_v13 = vmul.f32 %v5103_v5, %v1569_v1  ;;  %v1571_v14 = vmul.f32 %v5114_v8, %v1569_v1  ;;  %v1596_v19 = vmul.f32 %v5127_v15, %v1595_v6  ;;  %v1597_v20 = vmul.f32 %v5130_v16, %v1595_v6  ;;  %s5547_s8 = sld [smem:[#allocation2 + $0x4f]] }
  0x8c   : > { %4581 = vmatpush3.bf16.msk.msra.mxu1 %vm5160_vm5, %v4923_v35  ;;  %v1189_v21 = vadd.f32 %v1187_v59, %v1163_v18  ;;  %v1622_v23 = vmul.f32 %v5133_v17, %v1621_v7  ;;  %v1623_v24 = vmul.f32 %v5144_v22, %v1621_v7  ;;  %v1138_v25 = vadd.f32 %v1136_v55, %v1110_v47  ;;  %s5549_s26 = sld [smem:[#allocation2 + $0x6f]] }
  0x8d   : > { %v1572_v27 = vadd.f32 %v1570_v13, %v1544_v10  ;;  %4567 = vmatprep.subr.msk.bf16.mxu0 %vm5267_vm9, %v4923_v35  ;;  %v1573_v28 = vadd.f32 %v1571_v14, %v1545_v11  ;;  %4583 = vmatprep.subr.msk.bf16.mxu1 %vm5267_vm9, %v4923_v35  ;;  %v1121_v26 = vmul.f32 %v1120_v12, %v5093_v2  ;;  %v1146_v32 = vstv %s5463_s22  ;;  %s5574_s22 = sld [smem:[#allocation2 + $0x31]] }
  0x8e   : > { %4369 = vmatprep.mubr.msk.f32.mxu0 %vm338_vm0, %v1189_v21  ;;  %v1164_v9 = vadd.f32 %v1162_v58, %v1138_v25  ;;  %v1122_v33 = vmul.f32 %v1120_v12, %v5096_v3  ;;  %v1147_v36 = vmul.f32 %v5103_v5, %v1146_v32  ;;  %v1148_v4 = vmul.f32 %v5114_v8, %v1146_v32 }
  0x8f   : > { %v1598_v37 = vadd.f32 %v1596_v19, %v1572_v27  ;;  %v1599_v38 = vadd.f32 %v1597_v20, %v1573_v28  ;;  %v1172_v39 = vstv %s5470_s24  ;;  %v1198_v40 = vstv %s5472_s19  ;;  %s5579_s24 = sld [smem:[#allocation2 + $0x51]] }
  0x90   : > { %v1190_v41 = vadd.f32 %v1188_v63, %v1164_v9  ;;  %v1149_v42 = vadd.f32 %v1147_v36, %v1121_v26  ;;  %v1173_v43 = vmul.f32 %v5127_v15, %v1172_v39  ;;  %v1174_v44 = vmul.f32 %v5130_v16, %v1172_v39  ;;  %s5581_s19 = sld [smem:[#allocation2 + $0x71]] }
  0x91   : > { %v1624_v45 = vadd.f32 %v1622_v23, %v1598_v37  ;;  %v1625_v46 = vadd.f32 %v1623_v24, %v1599_v38  ;;  %v1199_v47 = vmul.f32 %v5133_v17, %v1198_v40  ;;  %v1200_v48 = vmul.f32 %v5144_v22, %v1198_v40 }
  0x92   : > { %4370 = vmatmul.mubr.msk.f32.vlgmr.msra.gmra.mrb[2].mxu0 %vm338_vm0, %v1190_v41  ;;  %v1175_v49 = vadd.f32 %v1173_v43, %v1149_v42  ;;  %v1555_v50 = vstv %s5480_s29  ;;  %v1581_v51 = vstv %s5489_s3  ;;  %v1607_v52 = vstv %s5491_s5  ;;  %s5593_s29 = sld [smem:[#allocation2 + $0x15]] }
  0x93   : > { %4397 = vmatprep.mubr.msk.f32.mxu1 %vm338_vm0, %v1624_v45  ;;  %4569 = vmatpush3.bf16.msk.msra.mxu0 %vm5267_vm9, %v4923_v35  ;;  %v1556_v53 = vmul.f32 %v1555_v50, %v5093_v2  ;;  %v1557_v54 = vmul.f32 %v1555_v50, %v5096_v3  ;;  %v1582_v55 = vmul.f32 %v5103_v5, %v1581_v51  ;;  %v1633_v56 = vstv %s5498_s16  ;;  %s5595_s3 = sld [smem:[#allocation2 + $0x35]] }
  0x94   : > { %4398 = vmatmul.mubr.msk.f32.vlgmr.msra.gmra.mrb[2].mxu1 %vm338_vm0, %v1625_v46  ;;  %v1201_v57 = vadd.f32 %v1199_v47, %v1175_v49  ;;  %v1583_v58 = vmul.f32 %v5114_v8, %v1581_v51  ;;  %v1608_v59 = vmul.f32 %v5127_v15, %v1607_v52  ;;  %v1609_v60 = vmul.f32 %v5130_v16, %v1607_v52  ;;  %s5604_s5 = sld [smem:[#allocation2 + $0x55]] }
  0x95   : > { %4585 = vmatpush3.bf16.msk.msra.mxu1 %vm5267_vm9, %v4923_v35  ;;  %v1584_v61 = vadd.f32 %v1582_v55, %v1556_v53  ;;  %v1634_v62 = vmul.f32 %v5133_v17, %v1633_v56  ;;  %v1635_v63 = vmul.f32 %v5144_v22, %v1633_v56  ;;  %v1150_v0 = vadd.f32 %v1148_v4, %v1122_v33  ;;  %s5606_s16 = sld [smem:[#allocation2 + $0x75]] }
  0x96   : > { %4376 = vmatprep.mubr.msk.f32.mxu0 %vm338_vm0, %v1201_v57  ;;  %4571 = vmatprep.subr.msk.bf16.mxu0 %vm5343_vm12, %v4923_v35  ;;  %v1585_v1 = vadd.f32 %v1583_v58, %v1557_v54  ;;  %v1126_v6 = vstv %s5513_s17  ;;  %v1152_v7 = vstv %s5519_s23  ;;  %v1178_v18 = vstv %s5521_s27  ;;  %s5615_s17 = sld [smem:[#allocation2 + $0x10]] }
  0x97   : > { %v1610_v10 = vadd.f32 %v1608_v59, %v1584_v61  ;;  %v1176_v11 = vadd.f32 %v1174_v44, %v1150_v0  ;;  %4587 = vmatprep.subr.msk.bf16.mxu1 %vm5343_vm12, %v4923_v35  ;;  %v1127_v12 = vmul.f32 %v1126_v6, %v5093_v2  ;;  %v1128_v13 = vmul.f32 %v1126_v6, %v5096_v3  ;;  %s5631_s23 = sld [smem:[#allocation2 + $0x30]] }
  0x98   : > { %v1611_v14 = vadd.f32 %v1609_v60, %v1585_v1  ;;  %v1153_v19 = vmul.f32 %v5103_v5, %v1152_v7  ;;  %v1154_v20 = vmul.f32 %v5114_v8, %v1152_v7  ;;  %v1179_v21 = vmul.f32 %v5127_v15, %v1178_v18  ;;  %s5638_s27 = sld [smem:[#allocation2 + $0x50]] }
  0x99   : > { %v1636_v23 = vadd.f32 %v1634_v62, %v1610_v10  ;;  %v1202_v24 = vadd.f32 %v1200_v48, %v1176_v11  ;;  %v1180_v25 = vmul.f32 %v5130_v16, %v1178_v18  ;;  %v1204_v27 = vstv %s5529_s28  ;;  %s5640_s28 = sld [smem:[#allocation2 + $0x70]] }
  0x9a   : > { %v1637_v28 = vadd.f32 %v1635_v63, %v1611_v14  ;;  %v1155_v26 = vadd.f32 %v1153_v19, %v1127_v12  ;;  %v1205_v32 = vmul.f32 %v5133_v17, %v1204_v27  ;;  %v1206_v9 = vmul.f32 %v5144_v22, %v1204_v27 }
  0x9b   : > { %4404 = vmatprep.mubr.msk.f32.mxu1 %vm338_vm0, %v1636_v23  ;;  %4377 = vmatmul.mubr.msk.f32.vlgmr.msra.gmra.mrb[2].mxu0 %vm338_vm0, %v1202_v24  ;;  %v1561_v33 = vstv %s5535_s30  ;;  %v1587_v36 = vstv %s5537_s6  ;;  %v1613_v4 = vstv %s5547_s8  ;;  %v1639_v37 = vstv %s5549_s26  ;;  %s5648_s30 = sld [smem:[#allocation2 + $0x14]] }
  0x9c   : > { %4405 = vmatmul.mubr.msk.f32.vlgmr.msra.gmra.mrb[2].mxu1 %vm338_vm0, %v1637_v28  ;;  %4573 = vmatpush3.bf16.msk.msra.mxu0 %vm5343_vm12, %v4923_v35  ;;  %v1181_v38 = vadd.f32 %v1179_v21, %v1155_v26  ;;  %v1562_v39 = vmul.f32 %v1561_v33, %v5093_v2  ;;  %v1563_v40 = vmul.f32 %v1561_v33, %v5096_v3  ;;  %v1984_v41 = vstv %s5555_s18  ;;  %s5657_s6 = sld [smem:[#allocation2 + $0x34]]  ;;  %s5681_s18 = sld [smem:[#allocation2 + $0x12]] }
  0x9d   : > { %4589 = vmatpush3.bf16.msk.msra.mxu1 %vm5343_vm12, %v4923_v35  ;;  %v1588_v42 = vmul.f32 %v5103_v5, %v1587_v36  ;;  %v1589_v43 = vmul.f32 %v5114_v8, %v1587_v36  ;;  %v1614_v44 = vmul.f32 %v5127_v15, %v1613_v4  ;;  %v1615_v45 = vmul.f32 %v5130_v16, %v1613_v4  ;;  %s5659_s8 = sld [smem:[#allocation2 + $0x54]] }
  0x9e   : > { %v1207_v46 = vadd.f32 %v1205_v32, %v1181_v38  ;;  %v1640_v47 = vmul.f32 %v5133_v17, %v1639_v37  ;;  %v1641_v48 = vmul.f32 %v5144_v22, %v1639_v37  ;;  %v1156_v49 = vadd.f32 %v1154_v20, %v1128_v13  ;;  %4591 = vmatprep.subr.msk.bf16.mxu0 %vm5166_vm6, %v4923_v35  ;;  %s5666_s26 = sld [smem:[#allocation2 + $0x74]] }
  0x9f   : > { %v1590_v50 = vadd.f32 %v1588_v42, %v1562_v39  ;;  %v1591_v51 = vadd.f32 %v1589_v43, %v1563_v40  ;;  %4607 = vmatprep.subr.msk.bf16.mxu1 %vm5166_vm6, %v4923_v35  ;;  %v1985_v52 = vmul.f32 %v1984_v41, %v5093_v2  ;;  %v1986_v53 = vmul.f32 %v1984_v41, %v5096_v3 }
  0xa0   : > { %4383 = vmatprep.mubr.msk.f32.mxu0 %vm338_vm0, %v1207_v46  ;;  %v1182_v54 = vadd.f32 %v1180_v25, %v1156_v49  ;;  %v2010_v55 = vstv %s5574_s22  ;;  %v2036_v56 = vstv %s5579_s24  ;;  %v2062_v57 = vstv %s5581_s19  ;;  %s5687_s22 = sld [smem:[#allocation2 + $0x32]] }
  0xa1   : > { %v1616_v58 = vadd.f32 %v1614_v44, %v1590_v50  ;;  %v1617_v59 = vadd.f32 %v1615_v45, %v1591_v51  ;;  %v2011_v60 = vmul.f32 %v5103_v5, %v2010_v55  ;;  %v2012_v61 = vmul.f32 %v5114_v8, %v2010_v55  ;;  %s5689_s24 = sld [smem:[#allocation2 + $0x52]]  ;;  %v5720_v55 = vld [vmem:[%s5084_s15 + $0x10] sm:$0xff] }
  0xa2   : > { %v1208_v62 = vadd.f32 %v1206_v9, %v1182_v54  ;;  %v2037_v63 = vmul.f32 %v5127_v15, %v2036_v56  ;;  %v2038_v0 = vmul.f32 %v5130_v16, %v2036_v56  ;;  %v2063_v1 = vmul.f32 %v5133_v17, %v2062_v57  ;;  %s5697_s19 = sld [smem:[#allocation2 + $0x72]] }
  0xa3   : > { %v1642_v6 = vadd.f32 %v1640_v47, %v1616_v58  ;;  %v1643_v7 = vadd.f32 %v1641_v48, %v1617_v59  ;;  %v2013_v18 = vadd.f32 %v2011_v60, %v1985_v52  ;;  %v2064_v10 = vmul.f32 %v5144_v22, %v2062_v57  ;;  %v5730_v59 = vld [vmem:[%s5084_s15 + $0x18] sm:$0xff] }
  0xa4   : > { %4384 = vmatmul.mubr.msk.f32.vlgmr.msra.gmra.mrb[2].mxu0 %vm338_vm0, %v1208_v62  ;;  %v2419_v11 = vstv %s5593_s29  ;;  %v2445_v12 = vstv %s5595_s3  ;;  %v2471_v13 = vstv %s5604_s5  ;;  %v2497_v14 = vstv %s5606_s16  ;;  %s5703_s29 = sld [smem:[#allocation2 + $0x16]] }
  0xa5   : > { %4411 = vmatprep.mubr.msk.f32.mxu1 %vm338_vm0, %v1642_v6  ;;  %4593 = vmatpush3.bf16.msk.msra.mxu0 %vm5166_vm6, %v4923_v35  ;;  %v2039_v19 = vadd.f32 %v2037_v63, %v2013_v18  ;;  %v2420_v20 = vmul.f32 %v2419_v11, %v5093_v2  ;;  %v2421_v21 = vmul.f32 %v2419_v11, %v5096_v3  ;;  %v1978_v23 = vstv %s5615_s17  ;;  %s5705_s3 = sld [smem:[#allocation2 + $0x36]]  ;;  %v5738_v63 = vld [vmem:[%s5084_s15 + $0x28] sm:$0xff]  ;;  %s5741_s17 = sld [smem:[#allocation2 + $0x13]]  ;;  %v5747_v6 = vld [vmem:[%s5084_s15 + $0x30] sm:$0xff]  ;;  %v5751_v18 = vld [vmem:[%s5084_s15 + $0x38] sm:$0xff] }
  0xa6   : > { %4412 = vmatmul.mubr.msk.f32.vlgmr.msra.gmra.mrb[2].mxu1 %vm338_vm0, %v1643_v7  ;;  %v2446_v24 = vmul.f32 %v5103_v5, %v2445_v12  ;;  %v2447_v25 = vmul.f32 %v5114_v8, %v2445_v12  ;;  %v2472_v27 = vmul.f32 %v5127_v15, %v2471_v13  ;;  %v2473_v28 = vmul.f32 %v5130_v16, %v2471_v13  ;;  %s5724_s5 = sld [smem:[#allocation2 + $0x56]] }
  0xa7   : > { %4609 = vmatpush3.bf16.msk.msra.mxu1 %vm5166_vm6, %v4923_v35  ;;  %v2065_v26 = vadd.f32 %v2063_v1, %v2039_v19  ;;  %v2498_v32 = vmul.f32 %v5133_v17, %v2497_v14  ;;  %v2499_v9 = vmul.f32 %v5144_v22, %v2497_v14  ;;  %v2014_v33 = vadd.f32 %v2012_v61, %v1986_v53  ;;  %s5726_s16 = sld [smem:[#allocation2 + $0x76]]  ;;  %v5734_v61 = vld [vmem:[%s5084_s15 + $0x20] sm:$0xff] }
  0xa8   : > { %v2448_v36 = vadd.f32 %v2446_v24, %v2420_v20  ;;  %4595 = vmatprep.subr.msk.bf16.mxu0 %vm5160_vm5, %v4923_v35  ;;  %v2449_v4 = vadd.f32 %v2447_v25, %v2421_v21  ;;  %4611 = vmatprep.subr.msk.bf16.mxu1 %vm5160_vm5, %v4923_v35  ;;  %v1979_v37 = vmul.f32 %v1978_v23, %v5093_v2  ;;  %v2004_v38 = vstv %s5631_s23  ;;  %s5766_s23 = sld [smem:[#allocation2 + $0x33]] }
  0xa9   : > { %4418 = vmatprep.mubr.msk.f32.mxu0 %vm338_vm0, %v2065_v26  ;;  %v2040_v39 = vadd.f32 %v2038_v0, %v2014_v33  ;;  %v1980_v40 = vmul.f32 %v1978_v23, %v5096_v3  ;;  %v2005_v41 = vmul.f32 %v5103_v5, %v2004_v38  ;;  %v2006_v42 = vmul.f32 %v5114_v8, %v2004_v38 }
  0xaa   : > { %v2474_v43 = vadd.f32 %v2472_v27, %v2448_v36  ;;  %v2475_v2 = vadd.f32 %v2473_v28, %v2449_v4  ;;  %v2030_v44 = vstv %s5638_s27  ;;  %v2056_v45 = vstv %s5640_s28  ;;  %s5771_s27 = sld [smem:[#allocation2 + $0x53]] }
  0xab   : > { %v2066_v46 = vadd.f32 %v2064_v10, %v2040_v39  ;;  %v2007_v47 = vadd.f32 %v2005_v41, %v1979_v37  ;;  %v2031_v48 = vmul.f32 %v5127_v15, %v2030_v44  ;;  %v2032_v3 = vmul.f32 %v5130_v16, %v2030_v44  ;;  %v5712_v16 = vld [vmem:[%s5084_s15] sm:$0xff]  ;;  %s5773_s28 = sld [smem:[#allocation2 + $0x73]] }
  0xac   : > { %v2500_v5 = vadd.f32 %v2498_v32, %v2474_v43  ;;  %v2501_v8 = vadd.f32 %v2499_v9, %v2475_v2  ;;  %v2057_v49 = vmul.f32 %v5133_v17, %v2056_v45  ;;  %v2058_v50 = vmul.f32 %v5144_v22, %v2056_v45  ;;  %v5716_v22 = vld [vmem:[%s5084_s15 + $0x8] sm:$0xff] }
  0xad   : > { %4419 = vmatmul.mubr.msk.f32.vlgmr.msra.gmra.mrb[4].mxu0 %vm338_vm0, %v2066_v46  ;;  %v2033_v51 = vadd.f32 %v2031_v48, %v2007_v47  ;;  %v2413_v52 = vstv %s5648_s30  ;;  %v2439_v53 = vstv %s5657_s6  ;;  %v2465_v15 = vstv %s5659_s8  ;;  %s5785_s30 = sld [smem:[#allocation2 + $0x17]] }
  0xae   : > { %4446 = vmatprep.mubr.msk.f32.mxu1 %vm338_vm0, %v2500_v5  ;;  %4597 = vmatpush3.bf16.msk.msra.mxu0 %vm5160_vm5, %v4923_v35  ;;  %v2414_v17 = vmul.f32 %v5712_v16, %v2413_v52  ;;  %v2415_v54 = vmul.f32 %v5716_v22, %v2413_v52  ;;  %v2440_v56 = vmul.f32 %v5720_v55, %v2439_v53  ;;  %v2491_v57 = vstv %s5666_s26  ;;  %s5787_s6 = sld [smem:[#allocation2 + $0x37]] }
  0xaf   : > { %4447 = vmatmul.mubr.msk.f32.vlgmr.msra.gmra.mrb[4].mxu1 %vm338_vm0, %v2501_v8  ;;  %v2059_v58 = vadd.f32 %v2057_v49, %v2033_v51  ;;  %v2441_v60 = vmul.f32 %v5730_v59, %v2439_v53  ;;  %v2466_v62 = vmul.f32 %v5734_v61, %v2465_v15  ;;  %v2467_v0 = vmul.f32 %v5738_v63, %v2465_v15  ;;  %s5796_s8 = sld [smem:[#allocation2 + $0x57]] }
  0xb0   : > { %4613 = vmatpush3.bf16.msk.msra.mxu1 %vm5160_vm5, %v4923_v35  ;;  %v2442_v1 = vadd.f32 %v2440_v56, %v2414_v17  ;;  %v2492_v7 = vmul.f32 %v5747_v6, %v2491_v57  ;;  %v2493_v10 = vmul.f32 %v5751_v18, %v2491_v57  ;;  %v2008_v11 = vadd.f32 %v2006_v42, %v1980_v40  ;;  %s5798_s26 = sld [smem:[#allocation2 + $0x77]] }
  0xb1   : > { %4425 = vmatprep.mubr.msk.f32.mxu0 %vm338_vm0, %v2059_v58  ;;  %4599 = vmatprep.subr.msk.bf16.mxu0 %vm5267_vm9, %v4923_v35  ;;  %v2443_v12 = vadd.f32 %v2441_v60, %v2415_v54  ;;  %v1990_v13 = vstv %s5681_s18  ;;  %v2016_v14 = vstv %s5687_s22  ;;  %v2042_v19 = vstv %s5689_s24  ;;  %s5807_s18 = sld [smem:[#allocation2 + $0x19]] }
  0xb2   : > { %v2468_v20 = vadd.f32 %v2466_v62, %v2442_v1  ;;  %v2034_v21 = vadd.f32 %v2032_v3, %v2008_v11  ;;  %4615 = vmatprep.subr.msk.bf16.mxu1 %vm5267_vm9, %v4923_v35  ;;  %v1991_v23 = vmul.f32 %v5712_v16, %v1990_v13  ;;  %v1992_v24 = vmul.f32 %v5716_v22, %v1990_v13  ;;  %s5823_s22 = sld [smem:[#allocation2 + $0x39]] }
  0xb3   : > { %v2469_v25 = vadd.f32 %v2467_v0, %v2443_v12  ;;  %v2017_v27 = vmul.f32 %v5720_v55, %v2016_v14  ;;  %v2018_v28 = vmul.f32 %v5730_v59, %v2016_v14  ;;  %v2043_v26 = vmul.f32 %v5734_v61, %v2042_v19  ;;  %s5830_s24 = sld [smem:[#allocation2 + $0x59]] }
  0xb4   : > { %v2494_v32 = vadd.f32 %v2492_v7, %v2468_v20  ;;  %v2060_v9 = vadd.f32 %v2058_v50, %v2034_v21  ;;  %v2044_v33 = vmul.f32 %v5738_v63, %v2042_v19  ;;  %v2068_v36 = vstv %s5697_s19  ;;  %s5832_s19 = sld [smem:[#allocation2 + $0x79]] }
  0xb5   : > { %v2495_v4 = vadd.f32 %v2493_v10, %v2469_v25  ;;  %v2019_v37 = vadd.f32 %v2017_v27, %v1991_v23  ;;  %v2069_v38 = vmul.f32 %v5747_v6, %v2068_v36  ;;  %v2070_v39 = vmul.f32 %v5751_v18, %v2068_v36 }
  0xb6   : > { %4453 = vmatprep.mubr.msk.f32.mxu1 %vm338_vm0, %v2494_v32  ;;  %4426 = vmatmul.mubr.msk.f32.vlgmr.msra.gmra.mrb[4].mxu0 %vm338_vm0, %v2060_v9  ;;  %v2425_v40 = vstv %s5703_s29  ;;  %v2451_v41 = vstv %s5705_s3  ;;  %v2477_v42 = vstv %s5724_s5  ;;  %v2503_v43 = vstv %s5726_s16  ;;  %s5840_s29 = sld [smem:[#allocation2 + $0x1d]] }
  0xb7   : > { %4454 = vmatmul.mubr.msk.f32.vlgmr.msra.gmra.mrb[4].mxu1 %vm338_vm0, %v2495_v4  ;;  %4601 = vmatpush3.bf16.msk.msra.mxu0 %vm5267_vm9, %v4923_v35  ;;  %v2045_v2 = vadd.f32 %v2043_v26, %v2019_v37  ;;  %v2426_v44 = vmul.f32 %v5712_v16, %v2425_v40  ;;  %v2427_v45 = vmul.f32 %v5716_v22, %v2425_v40  ;;  %v1996_v46 = vstv %s5741_s17  ;;  %v5849_v32 = vld [vmem:[%s5084_s15] sm:$0xff]  ;;  %s5852_s3 = sld [smem:[#allocation2 + $0x3d]]  ;;  %v5865_v37 = vld [vmem:[%s5084_s15 + $0x10] sm:$0xff]  ;;  %s5891_s17 = sld [smem:[#allocation2 + $0x18]] }
  0xb8   : > { %4617 = vmatpush3.bf16.msk.msra.mxu1 %vm5267_vm9, %v4923_v35  ;;  %v2452_v47 = vmul.f32 %v5720_v55, %v2451_v41  ;;  %v2453_v48 = vmul.f32 %v5730_v59, %v2451_v41  ;;  %v2478_v3 = vmul.f32 %v5734_v61, %v2477_v42  ;;  %v2479_v5 = vmul.f32 %v5738_v63, %v2477_v42  ;;  %s5854_s5 = sld [smem:[#allocation2 + $0x5d]] }
  0xb9   : > { %v2071_v8 = vadd.f32 %v2069_v38, %v2045_v2  ;;  %v2504_v49 = vmul.f32 %v5747_v6, %v2503_v43  ;;  %v2505_v50 = vmul.f32 %v5751_v18, %v2503_v43  ;;  %v2020_v51 = vadd.f32 %v2018_v28, %v1992_v24  ;;  %4603 = vmatprep.subr.msk.bf16.mxu0 %vm5343_vm12, %v4923_v35  ;;  %v5868_v38 = vld [vmem:[%s5084_s15 + $0x18] sm:$0xff]  ;;  %s5870_s16 = sld [smem:[#allocation2 + $0x7d]] }
  0xba   : > { %v2454_v52 = vadd.f32 %v2452_v47, %v2426_v44  ;;  %v2455_v53 = vadd.f32 %v2453_v48, %v2427_v45  ;;  %4619 = vmatprep.subr.msk.bf16.mxu1 %vm5343_vm12, %v4923_v35  ;;  %v1997_v15 = vmul.f32 %v5712_v16, %v1996_v46  ;;  %v1998_v17 = vmul.f32 %v5716_v22, %v1996_v46  ;;  %v5898_v46 = vld [vmem:[%s5084_s15 + $0x30] sm:$0xff]  ;;  %v5901_v47 = vld [vmem:[%s5084_s15 + $0x38] sm:$0xff] }
  0xbb   : > { %4432 = vmatprep.mubr.msk.f32.mxu0 %vm338_vm0, %v2071_v8  ;;  %v2046_v54 = vadd.f32 %v2044_v33, %v2020_v51  ;;  %v2022_v56 = vstv %s5766_s23  ;;  %v2048_v57 = vstv %s5771_s27  ;;  %v2074_v58 = vstv %s5773_s28  ;;  %s5903_s23 = sld [smem:[#allocation2 + $0x38]]  ;;  %s5919_s28 = sld [smem:[#allocation2 + $0x1c]] }
  0xbc   : > { %v2480_v60 = vadd.f32 %v2478_v3, %v2454_v52  ;;  %v2481_v62 = vadd.f32 %v2479_v5, %v2455_v53  ;;  %v2023_v0 = vmul.f32 %v5720_v55, %v2022_v56  ;;  %v2024_v1 = vmul.f32 %v5730_v59, %v2022_v56  ;;  %s5905_s27 = sld [smem:[#allocation2 + $0x58]] }
  0xbd   : > { %v2072_v7 = vadd.f32 %v2070_v39, %v2046_v54  ;;  %v2049_v10 = vmul.f32 %v5734_v61, %v2048_v57  ;;  %v2050_v11 = vmul.f32 %v5738_v63, %v2048_v57  ;;  %v2075_v12 = vmul.f32 %v5747_v6, %v2074_v58 }
  0xbe   : > { %v2506_v13 = vadd.f32 %v2504_v49, %v2480_v60  ;;  %v2507_v14 = vadd.f32 %v2505_v50, %v2481_v62  ;;  %v2025_v19 = vadd.f32 %v2023_v0, %v1997_v15  ;;  %v2076_v20 = vmul.f32 %v5751_v18, %v2074_v58 }
  0xbf   : > { %4433 = vmatmul.mubr.msk.f32.vlgmr.msra.gmra.mrb[4].mxu0 %vm338_vm0, %v2072_v7  ;;  %v2431_v21 = vstv %s5785_s30  ;;  %v2457_v23 = vstv %s5787_s6  ;;  %v2483_v24 = vstv %s5796_s8  ;;  %v2509_v25 = vstv %s5798_s26  ;;  %s5921_s30 = sld [smem:[#allocation2 + $0x3c]]  ;;  %s5939_s26 = sld [smem:[#allocation2 + $0x1a]] }
  0xc0   : > { %4460 = vmatprep.mubr.msk.f32.mxu1 %vm338_vm0, %v2506_v13  ;;  %4605 = vmatpush3.bf16.msk.msra.mxu0 %vm5343_vm12, %v4923_v35  ;;  %v2051_v27 = vadd.f32 %v2049_v10, %v2025_v19  ;;  %v2432_v28 = vmul.f32 %v5712_v16, %v2431_v21  ;;  %v2433_v26 = vmul.f32 %v5716_v22, %v2431_v21  ;;  %v2854_v9 = vstv %s5807_s18  ;;  %v5862_v22 = vld [vmem:[%s5084_s15 + $0x8] sm:$0xff]  ;;  %s5931_s6 = sld [smem:[#allocation2 + $0x5c]]  ;;  %s5958_s18 = sld [smem:[#allocation2 + $0x3a]] }
  0xc1   : > { %4461 = vmatmul.mubr.msk.f32.vlgmr.msra.gmra.mrb[4].mxu1 %vm338_vm0, %v2507_v14  ;;  %v2458_v33 = vmul.f32 %v5720_v55, %v2457_v23  ;;  %v2459_v36 = vmul.f32 %v5730_v59, %v2457_v23  ;;  %v2484_v4 = vmul.f32 %v5734_v61, %v2483_v24  ;;  %v2485_v16 = vmul.f32 %v5738_v63, %v2483_v24  ;;  %s5933_s8 = sld [smem:[#allocation2 + $0x7c]] }
  0xc2   : > { %4621 = vmatpush3.bf16.msk.msra.mxu1 %vm5343_vm12, %v4923_v35  ;;  %v2077_v55 = vadd.f32 %v2075_v12, %v2051_v27  ;;  %v2510_v59 = vmul.f32 %v5747_v6, %v2509_v25  ;;  %v2511_v61 = vmul.f32 %v5751_v18, %v2509_v25  ;;  %v2026_v63 = vadd.f32 %v2024_v1, %v1998_v17  ;;  %v5886_v6 = vld [vmem:[%s5084_s15 + $0x20] sm:$0xff]  ;;  %v5889_v18 = vld [vmem:[%s5084_s15 + $0x28] sm:$0xff]  ;;  %s5913_s15 = sld [smem:[#allocation2 + $0x78]] }
  0xc3   : > { %v2460_v39 = vadd.f32 %v2458_v33, %v2432_v28  ;;  %v2461_v40 = vadd.f32 %v2459_v36, %v2433_v26  ;;  %4623 = vmatprep.subr.msk.bf16.mxu0 %vm5166_vm6, %v4923_v35  ;;  %4639 = vmatprep.subr.msk.bf16.mxu1 %vm5166_vm6, %v4923_v35  ;;  %v2855_v41 = vmul.f32 %v2854_v9, %v5849_v32  ;;  %v2880_v42 = vstv %s5823_s22  ;;  %s5963_s22 = sld [smem:[#allocation2 + $0x5a]] }
  0xc4   : > { %4439 = vmatprep.mubr.msk.f32.mxu0 %vm338_vm0, %v2077_v55  ;;  %v2052_v43 = vadd.f32 %v2050_v11, %v2026_v63  ;;  %v2856_v2 = vmul.f32 %v2854_v9, %v5862_v22  ;;  %v2881_v44 = vmul.f32 %v5865_v37, %v2880_v42  ;;  %v2882_v45 = vmul.f32 %v5868_v38, %v2880_v42 }
  0xc5   : > { %v2486_v48 = vadd.f32 %v2484_v4, %v2460_v39  ;;  %v2487_v3 = vadd.f32 %v2485_v16, %v2461_v40  ;;  %v2906_v5 = vstv %s5830_s24  ;;  %v2932_v8 = vstv %s5832_s19  ;;  %s5965_s24 = sld [smem:[#allocation2 + $0x7a]]  ;;  %s5977_s19 = sld [smem:[#allocation2 + $0x1e]] }
  0xc6   : > { %v2078_v49 = vadd.f32 %v2076_v20, %v2052_v43  ;;  %v2883_v50 = vadd.f32 %v2881_v44, %v2855_v41  ;;  %v2907_v51 = vmul.f32 %v5886_v6, %v2906_v5  ;;  %v2908_v52 = vmul.f32 %v5889_v18, %v2906_v5 }
  0xc7   : > { %v2512_v53 = vadd.f32 %v2510_v59, %v2486_v48  ;;  %v2513_v15 = vadd.f32 %v2511_v61, %v2487_v3  ;;  %v2933_v17 = vmul.f32 %v5898_v46, %v2932_v8  ;;  %v2934_v54 = vmul.f32 %v5901_v47, %v2932_v8 }
  0xc8   : > { %4440 = vmatmul.mubr.msk.f32.vlgmr.msra.gmra.mrb[4].mxu0 %vm338_vm0, %v2078_v49  ;;  %v2909_v56 = vadd.f32 %v2907_v51, %v2883_v50  ;;  %v3289_v57 = vstv %s5840_s29  ;;  %v3315_v58 = vstv %s5852_s3  ;;  %v3341_v60 = vstv %s5854_s5  ;;  %s5979_s29 = sld [smem:[#allocation2 + $0x3e]] }
  0xc9   : > { %4467 = vmatprep.mubr.msk.f32.mxu1 %vm338_vm0, %v2512_v53  ;;  %4625 = vmatpush3.bf16.msk.msra.mxu0 %vm5166_vm6, %v4923_v35  ;;  %v3290_v62 = vmul.f32 %v3289_v57, %v5849_v32  ;;  %v3291_v0 = vmul.f32 %v3289_v57, %v5862_v22  ;;  %v3316_v1 = vmul.f32 %v5865_v37, %v3315_v58  ;;  %v3367_v7 = vstv %s5870_s16  ;;  %s5988_s3 = sld [smem:[#allocation2 + $0x5e]]  ;;  %s5999_s16 = sld [smem:[#allocation2 + $0x1b]] }
  0xca   : > { %4468 = vmatmul.mubr.msk.f32.vlgmr.msra.gmra.mrb[4].mxu1 %vm338_vm0, %v2513_v15  ;;  %v2935_v10 = vadd.f32 %v2933_v17, %v2909_v56  ;;  %v3317_v11 = vmul.f32 %v5868_v38, %v3315_v58  ;;  %v3342_v12 = vmul.f32 %v5886_v6, %v3341_v60  ;;  %v3343_v13 = vmul.f32 %v5889_v18, %v3341_v60  ;;  %s5990_s5 = sld [smem:[#allocation2 + $0x7e]] }
  0xcb   : > { %4641 = vmatpush3.bf16.msk.msra.mxu1 %vm5166_vm6, %v4923_v35  ;;  %v3318_v14 = vadd.f32 %v3316_v1, %v3290_v62  ;;  %v3368_v19 = vmul.f32 %v5898_v46, %v3367_v7  ;;  %v3369_v20 = vmul.f32 %v5901_v47, %v3367_v7  ;;  %v2884_v21 = vadd.f32 %v2882_v45, %v2856_v2 }
  0xcc   : > { %4474 = vmatprep.mubr.msk.f32.mxu0 %vm338_vm0, %v2935_v10  ;;  %4627 = vmatprep.subr.msk.bf16.mxu0 %vm5160_vm5, %v4923_v35  ;;  %v3319_v23 = vadd.f32 %v3317_v11, %v3291_v0  ;;  %v2848_v24 = vstv %s5891_s17  ;;  %v2874_v25 = vstv %s5903_s23  ;;  %v2900_v27 = vstv %s5905_s27  ;;  %s6015_s17 = sld [smem:[#allocation2 + $0x3b]] }
  0xcd   : > { %v3344_v28 = vadd.f32 %v3342_v12, %v3318_v14  ;;  %v2910_v30 = vadd.f32 %v2908_v52, %v2884_v21  ;;  %4643 = vmatprep.subr.msk.bf16.mxu1 %vm5160_vm5, %v4923_v35  ;;  %v2849_v26 = vmul.f32 %v2848_v24, %v5849_v32  ;;  %v2850_v9 = vmul.f32 %v2848_v24, %v5862_v22  ;;  %s6022_s23 = sld [smem:[#allocation2 + $0x5b]] }
  0xce   : > { %v3345_v33 = vadd.f32 %v3343_v13, %v3319_v23  ;;  %v2875_v36 = vmul.f32 %v5865_v37, %v2874_v25  ;;  %v2876_v4 = vmul.f32 %v5868_v38, %v2874_v25  ;;  %v2901_v16 = vmul.f32 %v5886_v6, %v2900_v27  ;;  %s6024_s27 = sld [smem:[#allocation2 + $0x7b]] }
  0xcf   : > { %v3370_v55 = vadd.f32 %v3368_v19, %v3344_v28  ;;  %v2936_v59 = vadd.f32 %v2934_v54, %v2910_v30  ;;  %v2902_v61 = vmul.f32 %v5889_v18, %v2900_v27  ;;  %v2926_v63 = vstv %s5913_s15  ;;  %s6032_s15 = sld [smem:[#allocation2 + $0x1f]] }
  0xd0   : > { %v3371_v39 = vadd.f32 %v3369_v20, %v3345_v33  ;;  %v2877_v40 = vadd.f32 %v2875_v36, %v2849_v26  ;;  %v2927_v41 = vmul.f32 %v5898_v46, %v2926_v63  ;;  %v2928_v42 = vmul.f32 %v5901_v47, %v2926_v63 }
  0xd1   : > { %4502 = vmatprep.mubr.msk.f32.mxu1 %vm338_vm0, %v3370_v55  ;;  %4475 = vmatmul.mubr.msk.f32.vlgmr.msra.gmra.mrb[6].mxu0 %vm338_vm0, %v2936_v59  ;;  %v3283_v43 = vstv %s5919_s28  ;;  %v3309_v2 = vstv %s5921_s30  ;;  %v3335_v44 = vstv %s5931_s6  ;;  %v3361_v45 = vstv %s5933_s8  ;;  %s6041_s28 = sld [smem:[#allocation2 + $0x3f]]  ;;  %s3841_s8 = sshll.u32 %s5080_s7, 7 }
  0xd2   : > { %4503 = vmatmul.mubr.msk.f32.vlgmr.msra.gmra.mrb[6].mxu1 %vm338_vm0, %v3371_v39  ;;  %4629 = vmatpush3.bf16.msk.msra.mxu0 %vm5160_vm5, %v4923_v35  ;;  %v2903_v48 = vadd.f32 %v2901_v16, %v2877_v40  ;;  %v3284_v3 = vmul.f32 %v3283_v43, %v5849_v32  ;;  %v3285_v5 = vmul.f32 %v3283_v43, %v5862_v22  ;;  %v2860_v8 = vstv %s5939_s26  ;;  %s6043_s30 = sld [smem:[#allocation2 + $0x5f]]  ;;  %s6101_s26 = scalar_lea.vmem [#allocation7], %s3841_s8 }
  0xd3   : > { %4645 = vmatpush3.bf16.msk.msra.mxu1 %vm5160_vm5, %v4923_v35  ;;  %v3310_v49 = vmul.f32 %v5865_v37, %v3309_v2  ;;  %v3311_v50 = vmul.f32 %v5868_v38, %v3309_v2  ;;  %v3336_v51 = vmul.f32 %v5886_v6, %v3335_v44  ;;  %v3337_v52 = vmul.f32 %v5889_v18, %v3335_v44  ;;  %s6050_s6 = sld [smem:[#allocation2 + $0x7f]] }
  0xd4   : > { %v2929_v53 = vadd.f32 %v2927_v41, %v2903_v48  ;;  %v3362_v15 = vmul.f32 %v5898_v46, %v3361_v45  ;;  %v3363_v17 = vmul.f32 %v5901_v47, %v3361_v45  ;;  %v2878_v29 = vadd.f32 %v2876_v4, %v2850_v9  ;;  %4631 = vmatprep.subr.msk.bf16.mxu0 %vm5267_vm9, %v4923_v35 }
  0xd5   : > { %v3312_v54 = vadd.f32 %v3310_v49, %v3284_v3  ;;  %v3313_v56 = vadd.f32 %v3311_v50, %v3285_v5  ;;  %4647 = vmatprep.subr.msk.bf16.mxu1 %vm5267_vm9, %v4923_v35  ;;  %v2861_v57 = vmul.f32 %v2860_v8, %v5849_v32  ;;  %v2862_v58 = vmul.f32 %v2860_v8, %v5862_v22 }
  0xd6   : > { %4481 = vmatprep.mubr.msk.f32.mxu0 %vm338_vm0, %v2929_v53  ;;  %v2904_v60 = vadd.f32 %v2902_v61, %v2878_v29  ;;  %v2886_v62 = vstv %s5958_s18  ;;  %v2912_v0 = vstv %s5963_s22  ;;  %v2938_v1 = vstv %s5965_s24  ;;  %s4173_s18 = sshll.u32 %s4909_s12, 11  ;;  %s3731_s22 = sshll.u32 %s6101_s26, 4  ;;  %s6134_s22 = int_to_ptr.vmem [resolvable:$true] %s3731_s22 }
  0xd7   : > { %v3338_v7 = vadd.f32 %v3336_v51, %v3312_v54  ;;  %v3339_v10 = vadd.f32 %v3337_v52, %v3313_v56  ;;  %v2887_v11 = vmul.f32 %v5865_v37, %v2886_v62  ;;  %v2888_v12 = vmul.f32 %v5868_v38, %v2886_v62  ;;  %s3716_s12 = scalar_lea.sflag [#allocation4], %s5080_s7 }
  0xd8   : > { %v2930_v13 = vadd.f32 %v2928_v42, %v2904_v60  ;;  %v2913_v14 = vmul.f32 %v5886_v6, %v2912_v0  ;;  %v2914_v19 = vmul.f32 %v5889_v18, %v2912_v0  ;;  %v2939_v20 = vmul.f32 %v5898_v46, %v2938_v1 }
  0xd9   : > { %v3364_v21 = vadd.f32 %v3362_v15, %v3338_v7  ;;  %v3365_v23 = vadd.f32 %v3363_v17, %v3339_v10  ;;  %v2889_v24 = vadd.f32 %v2887_v11, %v2861_v57  ;;  %v2940_v25 = vmul.f32 %v5901_v47, %v2938_v1 }
  0xda   : > { %4482 = vmatmul.mubr.msk.f32.vlgmr.msra.gmra.mrb[6].mxu0 %vm338_vm0, %v2930_v13  ;;  %v3295_v27 = vstv %s5977_s19  ;;  %v3321_v28 = vstv %s5979_s29  ;;  %v3347_v30 = vstv %s5988_s3  ;;  %v3373_v26 = vstv %s5990_s5  ;;  %s6132_s29 = scalar_lea.hbm %s6193_s2, %s4173_s18  ;;  %s4831_s3 = scalar_lea.vmem %s6134_s22, 2048 }
  0xdb   : > { %4509 = vmatprep.mubr.msk.f32.mxu1 %vm338_vm0, %v3364_v21  ;;  %4633 = vmatpush3.bf16.msk.msra.mxu0 %vm5267_vm9, %v4923_v35  ;;  %v2915_v9 = vadd.f32 %v2913_v14, %v2889_v24  ;;  %v3296_v33 = vmul.f32 %v3295_v27, %v5849_v32  ;;  %v3297_v36 = vmul.f32 %v3295_v27, %v5862_v22  ;;  %v2866_v4 = vstv %s5999_s16  ;;  %p4832_p8 = scmp.ne.s32.totalorder %s6134_s22, %s4831_s3  ;;  %s4924_s5 = smov [#allocation7]  }
  0xdc   : > { %4510 = vmatmul.mubr.msk.f32.vlgmr.msra.gmra.mrb[6].mxu1 %vm338_vm0, %v3365_v23  ;;  %v3322_v16 = vmul.f32 %v5865_v37, %v3321_v28  ;;  %v3323_v55 = vmul.f32 %v5868_v38, %v3321_v28  ;;  %v3348_v59 = vmul.f32 %v5886_v6, %v3347_v30  ;;  %v3349_v61 = vmul.f32 %v5889_v18, %v3347_v30  ;;  %s4835_s16 = sshll.u32 %s4924_s5, 4  ;;  %s4836_s16 = int_to_ptr.vmem [resolvable:$false] %s4835_s16 }
  0xdd   : > { %4649 = vmatpush3.bf16.msk.msra.mxu1 %vm5267_vm9, %v4923_v35  ;;  %v2941_v63 = vadd.f32 %v2939_v20, %v2915_v9  ;;  %v3374_v39 = vmul.f32 %v5898_v46, %v3373_v26  ;;  %v3375_v40 = vmul.f32 %v5901_v47, %v3373_v26  ;;  %v2890_v41 = vadd.f32 %v2888_v12, %v2862_v58  ;;  %p4833_p0 = pnand %p4832_p8, %p6214_p13  ;;  %p4838_p6 = scmp.lt.s32.totalorder %s6134_s22, %s4836_s16 }
  0xde   : > { %v3324_v42 = vadd.f32 %v3322_v16, %v3296_v33  ;;  %4635 = vmatprep.subr.msk.bf16.mxu0 %vm5343_vm12, %v4923_v35  ;;  %v3325_v43 = vadd.f32 %v3323_v55, %v3297_v36  ;;  %4651 = vmatprep.subr.msk.bf16.mxu1 %vm5343_vm12, %v4923_v35  ;;  %v2867_v34 = vmul.f32 %v2866_v4, %v5849_v32  ;;  %v2892_v2 = vstv %s6015_s17  ;;  %s4837_s17 = scalar_lea.vmem %s4836_s16, 4096 }
  0xdf   : > { %4488 = vmatprep.mubr.msk.f32.mxu0 %vm338_vm0, %v2941_v63  ;;  %v2916_v44 = vadd.f32 %v2914_v19, %v2890_v41  ;;  %v2868_v45 = vmul.f32 %v2866_v4, %v5862_v22  ;;  %v2893_v48 = vmul.f32 %v5865_v37, %v2892_v2  ;;  %v2918_v8 = vstv %s6022_s23  ;;  %p4834_p2 = pneg %p4833_p0  ;;  %p4839_p1 = scmp.lt.s32.totalorder %s4837_s17, %s4831_s3 }
  0xe0   : > { %v3350_v3 = vadd.f32 %v3348_v59, %v3324_v42  ;;  %v3351_v5 = vadd.f32 %v3349_v61, %v3325_v43  ;;  %v2944_v49 = vstv %s6024_s27  ;;  %v2894_v51 = vmul.f32 %v5868_v38, %v2892_v2 }
  0xe1   : > { %v2942_v50 = vadd.f32 %v2940_v25, %v2916_v44  ;;  %v2895_v52 = vadd.f32 %v2893_v48, %v2867_v34  ;;  %v2919_v53 = vmul.f32 %v5886_v6, %v2918_v8  ;;  %v2920_v29 = vmul.f32 %v5889_v18, %v2918_v8  ;;  %p4840_p7 = por %p4839_p1, %p4838_p6 }
  0xe2   : > { %v3376_v15 = vadd.f32 %v3374_v39, %v3350_v3  ;;  %v3377_v17 = vadd.f32 %v3375_v40, %v3351_v5  ;;  %v2945_v54 = vmul.f32 %v5898_v46, %v2944_v49  ;;  %v3301_v57 = vstv %s6032_s15 }
  0xe3   : > { %4489 = vmatmul.mubr.msk.f32.vlgmr.msra.gmra.mrb[6].mxu0 %vm338_vm0, %v2942_v50  ;;  %v2921_v56 = vadd.f32 %v2919_v53, %v2895_v52  ;;  %v3327_v58 = vstv %s6041_s28  ;;  %v3353_v60 = vstv %s6043_s30  ;;  %v3302_v62 = vmul.f32 %v3301_v57, %v5849_v32  ;;  %p4841_p12 = pnand %p4840_p7, %p4834_p2 }
  0xe4   : > { %4516 = vmatprep.mubr.msk.f32.mxu1 %vm338_vm0, %v3376_v15  ;;  %4637 = vmatpush3.bf16.msk.msra.mxu0 %vm5343_vm12, %v4923_v35  ;;  %v3303_v0 = vmul.f32 %v3301_v57, %v5862_v22  ;;  %v3328_v1 = vmul.f32 %v5865_v37, %v3327_v58  ;;  %v3379_v7 = vstv %s6050_s6  ;;  %v3329_v11 = vmul.f32 %v5868_v38, %v3327_v58 }
  0xe5   : > { %4517 = vmatmul.mubr.msk.f32.vlgmr.msra.gmra.mrb[6].mxu1 %vm338_vm0, %v3377_v17  ;;  %v2947_v10 = vadd.f32 %v2945_v54, %v2921_v56  ;;  %v3354_v12 = vmul.f32 %v5886_v6, %v3353_v60  ;;  %v3355_v13 = vmul.f32 %v5889_v18, %v3353_v60  ;;  %v2946_v32 = vmul.f32 %v5901_v47, %v2944_v49 }
  0xe6   : > { %4653 = vmatpush3.bf16.msk.msra.mxu1 %vm5343_vm12, %v4923_v35  ;;  %v3330_v22 = vadd.f32 %v3328_v1, %v3302_v62  ;;  %v3380_v37 = vmul.f32 %v5898_v46, %v3379_v7  ;;  %v2896_v14 = vadd.f32 %v2894_v51, %v2868_v45  ;;  %v3381_v19 = vmul.f32 %v5901_v47, %v3379_v7 }
  0xe7   : > { %4495 = vmatprep.mubr.msk.f32.mxu0 %vm338_vm0, %v2947_v10  ;;  %v3331_v38 = vadd.f32 %v3329_v11, %v3303_v0 }
  0xe8   : > { %v3356_v20 = vadd.f32 %v3354_v12, %v3330_v22  ;;  %v2922_v6 = vadd.f32 %v2920_v29, %v2896_v14 }
  0xe9   : > { %v3357_v21 = vadd.f32 %v3355_v13, %v3331_v38 }
  0xea   : > { %v3382_v18 = vadd.f32 %v3380_v37, %v3356_v20  ;;  %v2948_v23 = vadd.f32 %v2946_v32, %v2922_v6 }
  0xeb   : > { %v3383_v24 = vadd.f32 %v3381_v19, %v3357_v21 }
  0xec   : > { %4523 = vmatprep.mubr.msk.f32.mxu1 %vm338_vm0, %v3382_v18  ;;  %4496 = vmatmul.mubr.msk.f32.vlgmr.msra.gmra.mrb[6].mxu0 %vm338_vm0, %v2948_v23 }
  0xed   : > { %4524 = vmatmul.mubr.msk.f32.vlgmr.msra.gmra.mrb[6].mxu1 %vm338_vm0, %v3383_v24 }
 0x153   : > { %v4329_v35 = vpop.f32.mrb[0].mxu0 }
 0x154   : > { %669 = vst.msk [vmem:[%s6101_s26 + $0x8] sm:$0xff] %vm667_vm13, %v4329_v35  ;;  %v4357_v31 = vpop.f32.mrb[0].mxu1  ;;  %v656_v46 = vpop.f32.mrb[1].mxu0 }
 0x155   : > { %3926 = vst.msk [vmem:[%s6101_s26 + $0x18] sm:$0xff] %vm667_vm13, %v4357_v31  ;;  %668 = vst.msk [vmem:[%s6101_s26] sm:$0xff] %vm667_vm13, %v656_v46  ;;  %v1091_v47 = vpop.f32.mrb[1].mxu1 }
 0x156   : > { %3925 = vst.msk [vmem:[%s6101_s26 + $0x10] sm:$0xff] %vm667_vm13, %v1091_v47 }
 0x177   : > { %v4385_v25 = vpop.f32.mrb[2].mxu0 }
 0x178   : > { %3966 = vst.msk [vmem:[%s6101_s26 + $0x28] sm:$0xff] %vm667_vm13, %v4385_v25  ;;  %v1526_v27 = vpop.f32.mrb[3].mxu0 }
 0x179   : > { %v4413_v28 = vpop.f32.mrb[2].mxu1  ;;  %3965 = vst.msk [vmem:[%s6101_s26 + $0x20] sm:$0xff] %vm667_vm13, %v1526_v27 }
 0x17a   : > { %4006 = vst.msk [vmem:[%s6101_s26 + $0x38] sm:$0xff] %vm667_vm13, %v4413_v28  ;;  %v1961_v30 = vpop.f32.mrb[3].mxu1 }
 0x17b   : > { %4005 = vst.msk [vmem:[%s6101_s26 + $0x30] sm:$0xff] %vm667_vm13, %v1961_v30 }
 0x19b   : > { %v4441_v26 = vpop.f32.mrb[4].mxu0 }
 0x19c   : > { %4046 = vst.msk [vmem:[%s6101_s26 + $0x48] sm:$0xff] %vm667_vm13, %v4441_v26  ;;  %v2396_v9 = vpop.f32.mrb[5].mxu0 }
 0x19d   : > { %v4469_v33 = vpop.f32.mrb[4].mxu1  ;;  %4045 = vst.msk [vmem:[%s6101_s26 + $0x40] sm:$0xff] %vm667_vm13, %v2396_v9 }
 0x19e   : > { %4086 = vst.msk [vmem:[%s6101_s26 + $0x58] sm:$0xff] %vm667_vm13, %v4469_v33  ;;  %v2831_v36 = vpop.f32.mrb[5].mxu1 }
 0x19f   : > { %4085 = vst.msk [vmem:[%s6101_s26 + $0x50] sm:$0xff] %vm667_vm13, %v2831_v36 }
 0x1bf   : > { %v4497_v4 = vpop.f32.mrb[6].mxu0 }
 0x1c0   : > { %4126 = vst.msk [vmem:[%s6101_s26 + $0x68] sm:$0xff] %vm667_vm13, %v4497_v4  ;;  %v4525_v16 = vpop.f32.mrb[6].mxu1  ;;  %v3266_v55 = vpop.f32.mrb[7].mxu0 }
 0x1c1   : > { %4166 = vst.msk [vmem:[%s6101_s26 + $0x78] sm:$0xff] %vm667_vm13, %v4525_v16  ;;  %4125 = vst.msk [vmem:[%s6101_s26 + $0x60] sm:$0xff] %vm667_vm13, %v3266_v55  ;;  %v3701_v59 = vpop.f32.mrb[7].mxu1 }
 0x1c2   : > { %4165 = vst.msk [vmem:[%s6101_s26 + $0x70] sm:$0xff] %vm667_vm13, %v3701_v59 }
 0x1c3   : > { %4844 = shalt.err (!%p4841_p12)
}
 0x1c4   : > { %s4845_s23 = scalar_lea.hbm %s6132_s29, 2048  ;;  %s4849_s28 = scalar_lea.hbm %s6193_s2, 4096 }
 0x1c5   : > { %p4846_p4 = scmp.ne.s32.totalorder %s6132_s29, %s4845_s23  ;;  %p4850_p5 = scmp.lt.u32.totalorder %s6132_s29, %s6193_s2 }
 0x1c6   : > { %p4851_p9 = scmp.lt.u32.totalorder %s4849_s28, %s4845_s23  ;;  %p4853_p8 = scmp.lt.u32.totalorder %s4845_s23, %s6132_s29 }
 0x1c7   : > { %p4847_p10 = pnand %p4846_p4, %p6214_p13 }
 0x1c8   : > { %p4852_p3 = por %p4851_p9, %p4850_p5 }
 0x1c9   : > { %p4848_p11 = pneg %p4847_p10 }
 0x1ca   : > { %p4854_p0 = por %p4853_p8, %p4852_p3 }
 0x1cc   : > { %p4855_p2 = pnand %p4854_p0, %p4848_p11 }
 0x1ce   : > { %4858 = shalt.err (!%p4855_p2)
}
 0x1cf   : > { %s4925_s8 = smov 128   ;;  %s4926_s26 = smov 8  }
 0x1d0   : > { %4708 = dma.vmem_to_hbm [thread:$0]  (%p6214_p13), %s6134_s22, 2048, %s6132_s29, %s3716_s12, %s4925_s8, %s4925_s8, %s4926_s26  }
 0x1d1 PF: > { %s3746_s18 = sand.u32 1, %s4897_s9   ;;  %p6215_p6 = scmp.ne.s32.totalorder %s6201_s21, 0 }
 0x1d2   : > { %p6216_p1 = scmp.ge.s32.totalorder %s4917_s14, 2  ;;  %s3747_s24 = scalar_lea.sflag [#allocation4], %s3746_s18 }
 0x1d4   : > { %p4719_p7 = pnand %p6216_p1, %p6215_p6 }
 0x1d6   : > { %4892 = dma.done.wait (!%p4719_p7), %s3747_s24, 2048  }
 0x1d7   : > { %4894 = vsyncadd (!%p4719_p7), %s3747_s24, 4294965248  ;;  %s19_s14 = sadd.s32 1, %s4917_s14   ;;  %s6217_s9 = smov %s4901_s10 }
 0x1d8   : > { %p16_p12 = scmp.ge.s32.totalorder %s19_s14, 4   ;;  %s6218_s10 = smov %s4905_s11 }
 0x1d9   : > { %s6219_s11 = smov %s5043_s4  ;;  %s6220_s12 = smov %s4913_s13 }
 0x1da   : > { %s6221_s13 = smov %s6223_s25  ;;  %18 = sbr.rel (!%p16_p12) target bundleno = 7 (0x7), region = 88 }
 0x1e1   :  { %3752 = vsyncpa [#allocation3], 1 }
 0x1e2   :  { %3754 = vsyncpa [#allocation3 + $0x1], 1 }
 0x1e3   :  { %3755 = vsyncpa [#allocation4], 1 }
 0x1e4   :  { %3757 = vsyncpa [#allocation4 + $0x1], 1 }
 0x1e5   :  { %3758 = vsyncpa [#allocation5], 1 }
 0x1e6   :  { %3760 = vsyncpa [#allocation5 + $0x1], 1 }

</bundles_post_ra>
